<compile_context>
chip_gen: v7x
topology: tpu7x:2x2x1
jax: 0.10.0
libtpu: 0.0.40
codegen_flags: <defaults>
</compile_context>

<pallas_src>
import functools

import jax
import jax.numpy as jnp
import numpy as np
from jax.experimental import pallas as pl
from jax.experimental.pallas import tpu as pltpu


def _round_up(x, m):
    return ((x + m - 1) // m) * m


# ----------------------------------------------------------------------------
# fused kernel: one grid step == one batch sample
# ----------------------------------------------------------------------------
def _fused_ms_tcn_kernel(x_ref, wr_ref, br_ref, wt_ref, bt_ref, we_ref, be_ref,
                         o_ref, pad_buf, y_buf, acc_buf,
                         *, t_scale, K, V, TV, TVp, padL):
    padW = ((K - 1) // 2) * V                  # temporal 'same' padding in lanes
    cb = wt_ref.shape[2]                       # per-branch channel count
    Wbuf = pad_buf.shape[1]

    # ---- reduct 1x1 conv (BN folded) + ReLU -> bf16 VMEM scratch -----------
    y = (jnp.dot(wr_ref[...], x_ref[0], preferred_element_type=jnp.float32)
         + br_ref[...])
    y_buf[...] = jnp.maximum(y, 0.0).astype(jnp.bfloat16)

    # ---- zero ONLY the halo lanes of the padded temporal buffer ------------
    # left halo [0, padL) and everything right of the real data [padL+TV, end);
    # the data region [padL, padL+TV) is overwritten every branch.
    pad_buf[:, :padL] = jnp.zeros((cb, padL), jnp.bfloat16)
    pad_buf[:, padL + TV:] = jnp.zeros((cb, Wbuf - padL - TV), jnp.bfloat16)

    # ---- Res2Net temporal branches, expand conv fused into the loop --------
    sp = None
    for i in range(t_scale):
        chunk = y_buf[i * cb:(i + 1) * cb, :]                      # bf16 (cb, TVp)
        if i == 0:                                                 # no prev add at i==0
            sp_in = chunk
        else:
            sp_in = (sp + chunk.astype(jnp.float32)).astype(jnp.bfloat16)
        # lane-aligned (padL % 128 == 0) dense write of the real TV columns
        pad_buf[:, padL:padL + TV] = sp_in[:, :TV]

        # (K,1) temporal conv == K per-tap MXU matmuls accumulated in f32
        off = padL - padW
        acc = jnp.dot(wt_ref[i, 0], pad_buf[:, off:off + TVp],
                      preferred_element_type=jnp.float32)
        for k in range(1, K):
            off = padL - padW + k * V
            acc = acc + jnp.dot(wt_ref[i, k], pad_buf[:, off:off + TVp],
                                preferred_element_type=jnp.float32)
        sp = jnp.maximum(acc + bt_ref[i], 0.0)                     # f32 (cb, TVp)

        # expand 1x1 conv fused per branch (replaces mid_buf concat)
        contrib = jnp.dot(we_ref[:, i * cb:(i + 1) * cb], sp.astype(jnp.bfloat16),
                          preferred_element_type=jnp.float32)
        if i == 0:
            acc_buf[...] = contrib
        else:
            acc_buf[...] = acc_buf[...] + contrib

    # ---- expand bias (BN folded) + identity residual + ReLU ----------------
    out = acc_buf[...] + be_ref[...] + x_ref[0].astype(jnp.float32)
    o_ref[0] = jnp.maximum(out, 0.0)


# ----------------------------------------------------------------------------
# wrapper: one pallas_call for the whole layer
# ----------------------------------------------------------------------------
def ms_temporal_bottleneck(x_nchw, params, *, t_scale, kernel_size, stride=1):
    assert stride == 1  # TODO(synk): strided (conv-BN residual) / residual=False variants
    N, C, T, V = x_nchw.shape
    K = kernel_size
    inner = params["wr"].shape[0]
    cb = inner // t_scale
    TV = T * V
    TVp = _round_up(TV, 128)                 # lane-dense blocks / unmasked stores
    padW = ((K - 1) // 2) * V
    padL = _round_up(padW, 128)              # 128-aligned left halo -> aligned data writes
    padR = (K - 1) * V - padW                # right halo needed by the last tap

    # contiguous merge (T,V) -> T*V, cast to bf16, pad lanes up to 128-multiple
    x2 = x_nchw.reshape(N, C, TV).astype(jnp.bfloat16)
    if TVp != TV:
        x2 = jnp.pad(x2, ((0, 0), (0, 0), (0, TVp - TV)))

    wr = params["wr"].astype(jnp.bfloat16)
    we = params["we"].astype(jnp.bfloat16)
    # per-tap temporal weights transposed to (cout, cin): wt_all[i,k,d,c] = W_i[k,c,d]
    wt_all = jnp.stack([jnp.transpose(w, (0, 2, 1)) for w in params["wt"]]
                       ).astype(jnp.bfloat16)                      # (t_scale, K, cb, cb)
    bt_all = jnp.stack(params["bt"])                               # (t_scale, cb, 1) f32

    kern = functools.partial(_fused_ms_tcn_kernel, t_scale=t_scale, K=K, V=V,
                             TV=TV, TVp=TVp, padL=padL)

    out2 = pl.pallas_call(
        kern,
        out_shape=jax.ShapeDtypeStruct((N, C, TVp), jnp.float32),
        grid=(N,),
        in_specs=[
            pl.BlockSpec((1, C, TVp), lambda n: (n, 0, 0)),             # x (bf16)
            pl.BlockSpec((inner, C), lambda n: (0, 0)),                 # wr (bf16)
            pl.BlockSpec((inner, 1), lambda n: (0, 0)),                 # br (f32)
            pl.BlockSpec((t_scale, K, cb, cb), lambda n: (0, 0, 0, 0)),  # wt (bf16)
            pl.BlockSpec((t_scale, cb, 1), lambda n: (0, 0, 0)),        # bt (f32)
            pl.BlockSpec((C, inner), lambda n: (0, 0)),                 # we (bf16)
            pl.BlockSpec((C, 1), lambda n: (0, 0)),                     # be (f32)
        ],
        out_specs=pl.BlockSpec((1, C, TVp), lambda n: (n, 0, 0)),
        scratch_shapes=[
            pltpu.VMEM((cb, padL + TVp + padR), jnp.bfloat16),  # zero-halo padded branch input
            pltpu.VMEM((inner, TVp), jnp.bfloat16),             # reduct output (explicit spill)
            pltpu.VMEM((C, TVp), jnp.float32),                  # fused expand-conv accumulator
        ],
        compiler_params=pltpu.CompilerParams(
            dimension_semantics=("parallel",),   # batch axis -> both TCs on v7x
            vmem_limit_bytes=64 << 20,           # headroom at production shapes
        ),
    )(x2, wr, params["br"], wt_all, bt_all, we, params["be"])

    return out2[:, :, :TV].reshape(N, C, T, V)


# ----------------------------------------------------------------------------
# parameters (deterministic, BN folded into conv weights/bias)
# ----------------------------------------------------------------------------
def _conv_bn_params(key, shape_w, cout, cout_axis):
    k1, k2, k3, k4, k5, k6 = jax.random.split(key, 6)
    w = 0.1 * jax.random.normal(k1, shape_w, jnp.float32)
    b = 0.1 * jax.random.normal(k2, (cout,), jnp.float32)
    gamma = 1.0 + 0.1 * jax.random.normal(k3, (cout,), jnp.float32)
    beta = 0.1 * jax.random.normal(k4, (cout,), jnp.float32)
    mean = 0.1 * jax.random.normal(k5, (cout,), jnp.float32)
    var = 1.0 + 0.1 * jax.random.uniform(k6, (cout,), jnp.float32)
    scale = gamma / jnp.sqrt(var + 1e-5)
    bshape = [1] * len(shape_w)
    bshape[cout_axis] = cout
    w_f = (w * scale.reshape(bshape)).astype(jnp.float32)           # fold BN scale
    b_f = ((b - mean) * scale + beta).reshape(cout, 1).astype(jnp.float32)
    return w_f, b_f


def init_params(key, channels, t_scale, kernel_size, reduct_ratio):
    inner = channels // reduct_ratio
    assert inner % t_scale == 0
    cb = inner // t_scale
    keys = jax.random.split(key, 2 + t_scale)
    wr, br = _conv_bn_params(keys[0], (inner, channels), inner, 0)    # (cout, cin)
    we, be = _conv_bn_params(keys[1], (channels, inner), channels, 0)
    wt, bt = [], []
    for i in range(t_scale):
        w, b = _conv_bn_params(keys[2 + i], (kernel_size, cb, cb), cb, 2)  # (K, cin, cout)
        wt.append(w)
        bt.append(b)
    return {"wr": wr, "br": br, "wt": wt, "bt": bt, "we": we, "be": be}


# ----------------------------------------------------------------------------
# pure-JAX reference (NCHW, per-tap conv) for a correctness check
# ----------------------------------------------------------------------------
def reference_forward(x_nchw, params, *, t_scale, kernel_size):
    K = kernel_size
    pad = (K - 1) // 2
    x = x_nchw.astype(jnp.float32)
    res = x
    y = jax.nn.relu(jnp.einsum("oc,nctv->notv", params["wr"], x,
                               precision=jax.lax.Precision.HIGHEST)
                    + params["br"].reshape(1, -1, 1, 1))
    n, inner, t, v = y.shape
    cb = inner // t_scale
    sp = None
    outs = []
    for i in range(t_scale):
        chunk = y[:, i * cb:(i + 1) * cb]
        sp_in = chunk if i == 0 else sp + chunk
        sp_pad = jnp.pad(sp_in, ((0, 0), (0, 0), (pad, pad), (0, 0)))
        acc = jnp.zeros_like(chunk) + params["bt"][i].reshape(1, cb, 1, 1)
        for k in range(K):
            acc = acc + jnp.einsum("nctv,cd->ndtv", sp_pad[:, :, k:k + t, :],
                                   params["wt"][i][k],
                                   precision=jax.lax.Precision.HIGHEST)
        sp = jax.nn.relu(acc)
        outs.append(sp)
    mid = jnp.concatenate(outs, axis=1)
    out = jax.nn.relu(jnp.einsum("oc,nctv->notv", params["we"], mid,
                                 precision=jax.lax.Precision.HIGHEST)
                      + params["be"].reshape(1, -1, 1, 1) + res)
    return out


# ----------------------------------------------------------------------------
if __name__ == "__main__":
    key = jax.random.PRNGKey(0)
    kx, kp = jax.random.split(key)

    N, C, T, V = 2, 32, 16, 8          # (batch, channels, frames, vertices)
    T_SCALE, KERNEL, REDUCT = 2, 9, 2  # inner=16, per-branch cb=8

    x = jax.random.normal(kx, (N, C, T, V), jnp.float32)
    params = init_params(kp, C, T_SCALE, KERNEL, REDUCT)

    out = ms_temporal_bottleneck(x, params, t_scale=T_SCALE, kernel_size=KERNEL)
    out = jax.block_until_ready(out)

    ref = reference_forward(x, params, t_scale=T_SCALE, kernel_size=KERNEL)
    # tolerance absorbs bf16 MXU inputs (f32 accumulation, f32 bias/residual/ReLU)
    np.testing.assert_allclose(np.asarray(out), np.asarray(ref), rtol=2e-2, atol=2e-2)
    assert out.shape == (N, C, T, V)
    assert out.dtype == jnp.float32

    print("KERNEL_OK")
</pallas_src>

<mosaic_0001>
module attributes {stable_mosaic.version = 11 : i64} {
  func.func @_fused_ms_tcn_kernel(%arg0: i32, %arg1: memref<1x32x128xbf16, #tpu.memory_space<vmem>>, %arg2: memref<16x32xbf16, #tpu.memory_space<vmem>>, %arg3: memref<16x1xf32, #tpu.memory_space<vmem>>, %arg4: memref<2x9x8x8xbf16, #tpu.memory_space<vmem>>, %arg5: memref<2x8x1xf32, #tpu.memory_space<vmem>>, %arg6: memref<32x16xbf16, #tpu.memory_space<vmem>>, %arg7: memref<32x1xf32, #tpu.memory_space<vmem>>, %arg8: memref<1x32x128xf32, #tpu.memory_space<vmem>>, %arg9: memref<8x288xbf16, #tpu.memory_space<vmem>>, %arg10: memref<16x128xbf16, #tpu.memory_space<vmem>>, %arg11: memref<32x128xf32, #tpu.memory_space<vmem>>) attributes {dimension_semantics = [#tpu.dimension_semantics<parallel>], iteration_bounds = array<i64: 2>, scalar_prefetch = 0 : i64, scratch_operands = 3 : i64, tpu.core_type = #tpu.core_type<tc>, window_params = [{transform_indices = @transform_0, window_bounds = array<i64: 1, 32, 128>}, {pipeline_mode = #tpu.pipeline_mode<synchronous>, transform_indices = @transform_1, window_bounds = array<i64: 16, 32>}, {pipeline_mode = #tpu.pipeline_mode<synchronous>, transform_indices = @transform_2, window_bounds = array<i64: 16, 1>}, {pipeline_mode = #tpu.pipeline_mode<synchronous>, transform_indices = @transform_3, window_bounds = array<i64: 2, 9, 8, 8>}, {pipeline_mode = #tpu.pipeline_mode<synchronous>, transform_indices = @transform_4, window_bounds = array<i64: 2, 8, 1>}, {pipeline_mode = #tpu.pipeline_mode<synchronous>, transform_indices = @transform_5, window_bounds = array<i64: 32, 16>}, {pipeline_mode = #tpu.pipeline_mode<synchronous>, transform_indices = @transform_6, window_bounds = array<i64: 32, 1>}, {transform_indices = @transform_7, window_bounds = array<i64: 1, 32, 128>}]} {
    %c0 = arith.constant 0 : index
    %c0_0 = arith.constant 0 : index
    %0 = vector.load %arg2[%c0, %c0_0] : memref<16x32xbf16, #tpu.memory_space<vmem>>, vector<16x32xbf16>
    %c0_1 = arith.constant 0 : index
    %c0_2 = arith.constant 0 : index
    %c0_3 = arith.constant 0 : index
    %1 = vector.load %arg1[%c0_1, %c0_2, %c0_3] : memref<1x32x128xbf16, #tpu.memory_space<vmem>>, vector<1x32x128xbf16>
    %2 = vector.shape_cast %1 : vector<1x32x128xbf16> to vector<32x128xbf16>
    %cst = arith.constant dense<0.000000e+00> : vector<16x128xf32>
    %3 = tpu.matmul %0, %2, %cst {dimension_numbers = #tpu.dot_dimension_numbers<[1], [0], [0], [1], [0, 0, 1, 1], [], []>} : vector<16x32xbf16>, vector<32x128xbf16>, vector<16x128xf32> -> vector<16x128xf32>
    %c0_4 = arith.constant 0 : index
    %c0_5 = arith.constant 0 : index
    %4 = vector.load %arg3[%c0_4, %c0_5] : memref<16x1xf32, #tpu.memory_space<vmem>>, vector<16x1xf32>
    %5 = vector.broadcast %4 : vector<16x1xf32> to vector<16x128xf32>
    %6 = arith.addf %3, %5 : vector<16x128xf32>
    %cst_6 = arith.constant 0.000000e+00 : f32
    %7 = vector.broadcast %cst_6 : f32 to vector<16x128xf32>
    %8 = arith.maximumf %6, %7 : vector<16x128xf32>
    %9 = arith.truncf %8 : vector<16x128xf32> to vector<16x128xbf16>
    %c0_7 = arith.constant 0 : index
    %c0_8 = arith.constant 0 : index
    %10 = vector.load %arg10[%c0_7, %c0_8] : memref<16x128xbf16, #tpu.memory_space<vmem>>, vector<16x128xbf16>
    tpu.vector_store %arg10[%c0_7, %c0_8], %9 {strides = array<i32>} : memref<16x128xbf16, #tpu.memory_space<vmem>>, vector<16x128xbf16>,
    %cst_9 = arith.constant 0.000000e+00 : bf16
    %11 = vector.broadcast %cst_9 : bf16 to vector<8x128xbf16>
    %c0_10 = arith.constant 0 : index
    %c0_11 = arith.constant 0 : index
    %12 = vector.load %arg9[%c0_10, %c0_11] : memref<8x288xbf16, #tpu.memory_space<vmem>>, vector<8x128xbf16>
    tpu.vector_store %arg9[%c0_10, %c0_11], %11 {strides = array<i32>} : memref<8x288xbf16, #tpu.memory_space<vmem>>, vector<8x128xbf16>,
    %cst_12 = arith.constant 0.000000e+00 : bf16
    %13 = vector.broadcast %cst_12 : bf16 to vector<8x32xbf16>
    %c0_13 = arith.constant 0 : index
    %c256 = arith.constant 256 : index
    %14 = vector.load %arg9[%c0_13, %c256] : memref<8x288xbf16, #tpu.memory_space<vmem>>, vector<8x32xbf16>
    tpu.vector_store %arg9[%c0_13, %c256], %13 {strides = array<i32>} : memref<8x288xbf16, #tpu.memory_space<vmem>>, vector<8x32xbf16>,
    %c0_14 = arith.constant 0 : index
    %c0_15 = arith.constant 0 : index
    %15 = vector.load %arg10[%c0_14, %c0_15] : memref<16x128xbf16, #tpu.memory_space<vmem>>, vector<8x128xbf16>
    %c0_16 = arith.constant 0 : index
    %c128 = arith.constant 128 : index
    %16 = vector.load %arg9[%c0_16, %c128] : memref<8x288xbf16, #tpu.memory_space<vmem>>, vector<8x128xbf16>
    tpu.vector_store %arg9[%c0_16, %c128], %15 {strides = array<i32>} : memref<8x288xbf16, #tpu.memory_space<vmem>>, vector<8x128xbf16>,
    %c0_17 = arith.constant 0 : index
    %c0_18 = arith.constant 0 : index
    %c0_19 = arith.constant 0 : index
    %c0_20 = arith.constant 0 : index
    %17 = vector.load %arg4[%c0_17, %c0_18, %c0_19, %c0_20] : memref<2x9x8x8xbf16, #tpu.memory_space<vmem>>, vector<1x1x8x8xbf16>
    %18 = vector.shape_cast %17 : vector<1x1x8x8xbf16> to vector<8x8xbf16>
    %c0_21 = arith.constant 0 : index
    %c96 = arith.constant 96 : index
    %19 = vector.load %arg9[%c0_21, %c96] : memref<8x288xbf16, #tpu.memory_space<vmem>>, vector<8x128xbf16>
    %cst_22 = arith.constant dense<0.000000e+00> : vector<8x128xf32>
    %20 = tpu.matmul %18, %19, %cst_22 {dimension_numbers = #tpu.dot_dimension_numbers<[1], [0], [0], [1], [0, 0, 1, 1], [], []>} : vector<8x8xbf16>, vector<8x128xbf16>, vector<8x128xf32> -> vector<8x128xf32>
    %c0_23 = arith.constant 0 : index
    %c1 = arith.constant 1 : index
    %c0_24 = arith.constant 0 : index
    %c0_25 = arith.constant 0 : index
    %21 = vector.load %arg4[%c0_23, %c1, %c0_24, %c0_25] : memref<2x9x8x8xbf16, #tpu.memory_space<vmem>>, vector<1x1x8x8xbf16>
    %22 = vector.shape_cast %21 : vector<1x1x8x8xbf16> to vector<8x8xbf16>
    %c0_26 = arith.constant 0 : index
    %c104 = arith.constant 104 : index
    %23 = vector.load %arg9[%c0_26, %c104] : memref<8x288xbf16, #tpu.memory_space<vmem>>, vector<8x128xbf16>
    %cst_27 = arith.constant dense<0.000000e+00> : vector<8x128xf32>
    %24 = tpu.matmul %22, %23, %cst_27 {dimension_numbers = #tpu.dot_dimension_numbers<[1], [0], [0], [1], [0, 0, 1, 1], [], []>} : vector<8x8xbf16>, vector<8x128xbf16>, vector<8x128xf32> -> vector<8x128xf32>
    %25 = arith.addf %20, %24 : vector<8x128xf32>
    %c0_28 = arith.constant 0 : index
    %c2 = arith.constant 2 : index
    %c0_29 = arith.constant 0 : index
    %c0_30 = arith.constant 0 : index
    %26 = vector.load %arg4[%c0_28, %c2, %c0_29, %c0_30] : memref<2x9x8x8xbf16, #tpu.memory_space<vmem>>, vector<1x1x8x8xbf16>
    %27 = vector.shape_cast %26 : vector<1x1x8x8xbf16> to vector<8x8xbf16>
    %c0_31 = arith.constant 0 : index
    %c112 = arith.constant 112 : index
    %28 = vector.load %arg9[%c0_31, %c112] : memref<8x288xbf16, #tpu.memory_space<vmem>>, vector<8x128xbf16>
    %cst_32 = arith.constant dense<0.000000e+00> : vector<8x128xf32>
    %29 = tpu.matmul %27, %28, %cst_32 {dimension_numbers = #tpu.dot_dimension_numbers<[1], [0], [0], [1], [0, 0, 1, 1], [], []>} : vector<8x8xbf16>, vector<8x128xbf16>, vector<8x128xf32> -> vector<8x128xf32>
    %30 = arith.addf %25, %29 : vector<8x128xf32>
    %c0_33 = arith.constant 0 : index
    %c3 = arith.constant 3 : index
    %c0_34 = arith.constant 0 : index
    %c0_35 = arith.constant 0 : index
    %31 = vector.load %arg4[%c0_33, %c3, %c0_34, %c0_35] : memref<2x9x8x8xbf16, #tpu.memory_space<vmem>>, vector<1x1x8x8xbf16>
    %32 = vector.shape_cast %31 : vector<1x1x8x8xbf16> to vector<8x8xbf16>
    %c0_36 = arith.constant 0 : index
    %c120 = arith.constant 120 : index
    %33 = vector.load %arg9[%c0_36, %c120] : memref<8x288xbf16, #tpu.memory_space<vmem>>, vector<8x128xbf16>
    %cst_37 = arith.constant dense<0.000000e+00> : vector<8x128xf32>
    %34 = tpu.matmul %32, %33, %cst_37 {dimension_numbers = #tpu.dot_dimension_numbers<[1], [0], [0], [1], [0, 0, 1, 1], [], []>} : vector<8x8xbf16>, vector<8x128xbf16>, vector<8x128xf32> -> vector<8x128xf32>
    %35 = arith.addf %30, %34 : vector<8x128xf32>
    %c0_38 = arith.constant 0 : index
    %c4 = arith.constant 4 : index
    %c0_39 = arith.constant 0 : index
    %c0_40 = arith.constant 0 : index
    %36 = vector.load %arg4[%c0_38, %c4, %c0_39, %c0_40] : memref<2x9x8x8xbf16, #tpu.memory_space<vmem>>, vector<1x1x8x8xbf16>
    %37 = vector.shape_cast %36 : vector<1x1x8x8xbf16> to vector<8x8xbf16>
    %c0_41 = arith.constant 0 : index
    %c128_42 = arith.constant 128 : index
    %38 = vector.load %arg9[%c0_41, %c128_42] : memref<8x288xbf16, #tpu.memory_space<vmem>>, vector<8x128xbf16>
    %cst_43 = arith.constant dense<0.000000e+00> : vector<8x128xf32>
    %39 = tpu.matmul %37, %38, %cst_43 {dimension_numbers = #tpu.dot_dimension_numbers<[1], [0], [0], [1], [0, 0, 1, 1], [], []>} : vector<8x8xbf16>, vector<8x128xbf16>, vector<8x128xf32> -> vector<8x128xf32>
    %40 = arith.addf %35, %39 : vector<8x128xf32>
    %c0_44 = arith.constant 0 : index
    %c5 = arith.constant 5 : index
    %c0_45 = arith.constant 0 : index
    %c0_46 = arith.constant 0 : index
    %41 = vector.load %arg4[%c0_44, %c5, %c0_45, %c0_46] : memref<2x9x8x8xbf16, #tpu.memory_space<vmem>>, vector<1x1x8x8xbf16>
    %42 = vector.shape_cast %41 : vector<1x1x8x8xbf16> to vector<8x8xbf16>
    %c0_47 = arith.constant 0 : index
    %c136 = arith.constant 136 : index
    %43 = vector.load %arg9[%c0_47, %c136] : memref<8x288xbf16, #tpu.memory_space<vmem>>, vector<8x128xbf16>
    %cst_48 = arith.constant dense<0.000000e+00> : vector<8x128xf32>
    %44 = tpu.matmul %42, %43, %cst_48 {dimension_numbers = #tpu.dot_dimension_numbers<[1], [0], [0], [1], [0, 0, 1, 1], [], []>} : vector<8x8xbf16>, vector<8x128xbf16>, vector<8x128xf32> -> vector<8x128xf32>
    %45 = arith.addf %40, %44 : vector<8x128xf32>
    %c0_49 = arith.constant 0 : index
    %c6 = arith.constant 6 : index
    %c0_50 = arith.constant 0 : index
    %c0_51 = arith.constant 0 : index
    %46 = vector.load %arg4[%c0_49, %c6, %c0_50, %c0_51] : memref<2x9x8x8xbf16, #tpu.memory_space<vmem>>, vector<1x1x8x8xbf16>
    %47 = vector.shape_cast %46 : vector<1x1x8x8xbf16> to vector<8x8xbf16>
    %c0_52 = arith.constant 0 : index
    %c144 = arith.constant 144 : index
    %48 = vector.load %arg9[%c0_52, %c144] : memref<8x288xbf16, #tpu.memory_space<vmem>>, vector<8x128xbf16>
    %cst_53 = arith.constant dense<0.000000e+00> : vector<8x128xf32>
    %49 = tpu.matmul %47, %48, %cst_53 {dimension_numbers = #tpu.dot_dimension_numbers<[1], [0], [0], [1], [0, 0, 1, 1], [], []>} : vector<8x8xbf16>, vector<8x128xbf16>, vector<8x128xf32> -> vector<8x128xf32>
    %50 = arith.addf %45, %49 : vector<8x128xf32>
    %c0_54 = arith.constant 0 : index
    %c7 = arith.constant 7 : index
    %c0_55 = arith.constant 0 : index
    %c0_56 = arith.constant 0 : index
    %51 = vector.load %arg4[%c0_54, %c7, %c0_55, %c0_56] : memref<2x9x8x8xbf16, #tpu.memory_space<vmem>>, vector<1x1x8x8xbf16>
    %52 = vector.shape_cast %51 : vector<1x1x8x8xbf16> to vector<8x8xbf16>
    %c0_57 = arith.constant 0 : index
    %c152 = arith.constant 152 : index
    %53 = vector.load %arg9[%c0_57, %c152] : memref<8x288xbf16, #tpu.memory_space<vmem>>, vector<8x128xbf16>
    %cst_58 = arith.constant dense<0.000000e+00> : vector<8x128xf32>
    %54 = tpu.matmul %52, %53, %cst_58 {dimension_numbers = #tpu.dot_dimension_numbers<[1], [0], [0], [1], [0, 0, 1, 1], [], []>} : vector<8x8xbf16>, vector<8x128xbf16>, vector<8x128xf32> -> vector<8x128xf32>
    %55 = arith.addf %50, %54 : vector<8x128xf32>
    %c0_59 = arith.constant 0 : index
    %c8 = arith.constant 8 : index
    %c0_60 = arith.constant 0 : index
    %c0_61 = arith.constant 0 : index
    %56 = vector.load %arg4[%c0_59, %c8, %c0_60, %c0_61] : memref<2x9x8x8xbf16, #tpu.memory_space<vmem>>, vector<1x1x8x8xbf16>
    %57 = vector.shape_cast %56 : vector<1x1x8x8xbf16> to vector<8x8xbf16>
    %c0_62 = arith.constant 0 : index
    %c160 = arith.constant 160 : index
    %58 = vector.load %arg9[%c0_62, %c160] : memref<8x288xbf16, #tpu.memory_space<vmem>>, vector<8x128xbf16>
    %cst_63 = arith.constant dense<0.000000e+00> : vector<8x128xf32>
    %59 = tpu.matmul %57, %58, %cst_63 {dimension_numbers = #tpu.dot_dimension_numbers<[1], [0], [0], [1], [0, 0, 1, 1], [], []>} : vector<8x8xbf16>, vector<8x128xbf16>, vector<8x128xf32> -> vector<8x128xf32>
    %60 = arith.addf %55, %59 : vector<8x128xf32>
    %c0_64 = arith.constant 0 : index
    %c0_65 = arith.constant 0 : index
    %c0_66 = arith.constant 0 : index
    %61 = vector.load %arg5[%c0_64, %c0_65, %c0_66] : memref<2x8x1xf32, #tpu.memory_space<vmem>>, vector<1x8x1xf32>
    %62 = vector.shape_cast %61 : vector<1x8x1xf32> to vector<8x1xf32>
    %63 = vector.broadcast %62 : vector<8x1xf32> to vector<8x128xf32>
    %64 = arith.addf %60, %63 : vector<8x128xf32>
    %cst_67 = arith.constant 0.000000e+00 : f32
    %65 = vector.broadcast %cst_67 : f32 to vector<8x128xf32>
    %66 = arith.maximumf %64, %65 : vector<8x128xf32>
    %c0_68 = arith.constant 0 : index
    %c0_69 = arith.constant 0 : index
    %67 = vector.load %arg6[%c0_68, %c0_69] : memref<32x16xbf16, #tpu.memory_space<vmem>>, vector<32x8xbf16>
    %68 = arith.truncf %66 : vector<8x128xf32> to vector<8x128xbf16>
    %cst_70 = arith.constant dense<0.000000e+00> : vector<32x128xf32>
    %69 = tpu.matmul %67, %68, %cst_70 {dimension_numbers = #tpu.dot_dimension_numbers<[1], [0], [0], [1], [0, 0, 1, 1], [], []>} : vector<32x8xbf16>, vector<8x128xbf16>, vector<32x128xf32> -> vector<32x128xf32>
    %c0_71 = arith.constant 0 : index
    %c0_72 = arith.constant 0 : index
    %70 = vector.load %arg11[%c0_71, %c0_72] : memref<32x128xf32, #tpu.memory_space<vmem>>, vector<32x128xf32>
    tpu.vector_store %arg11[%c0_71, %c0_72], %69 {strides = array<i32>} : memref<32x128xf32, #tpu.memory_space<vmem>>, vector<32x128xf32>,
    %c8_73 = arith.constant 8 : index
    %c0_74 = arith.constant 0 : index
    %71 = vector.load %arg10[%c8_73, %c0_74] : memref<16x128xbf16, #tpu.memory_space<vmem>>, vector<8x128xbf16>
    %72 = arith.extf %71 : vector<8x128xbf16> to vector<8x128xf32>
    %73 = arith.addf %66, %72 : vector<8x128xf32>
    %74 = arith.truncf %73 : vector<8x128xf32> to vector<8x128xbf16>
    %c0_75 = arith.constant 0 : index
    %c128_76 = arith.constant 128 : index
    %75 = vector.load %arg9[%c0_75, %c128_76] : memref<8x288xbf16, #tpu.memory_space<vmem>>, vector<8x128xbf16>
    tpu.vector_store %arg9[%c0_75, %c128_76], %74 {strides = array<i32>} : memref<8x288xbf16, #tpu.memory_space<vmem>>, vector<8x128xbf16>,
    %c1_77 = arith.constant 1 : index
    %c0_78 = arith.constant 0 : index
    %c0_79 = arith.constant 0 : index
    %c0_80 = arith.constant 0 : index
    %76 = vector.load %arg4[%c1_77, %c0_78, %c0_79, %c0_80] : memref<2x9x8x8xbf16, #tpu.memory_space<vmem>>, vector<1x1x8x8xbf16>
    %77 = vector.shape_cast %76 : vector<1x1x8x8xbf16> to vector<8x8xbf16>
    %c0_81 = arith.constant 0 : index
    %c96_82 = arith.constant 96 : index
    %78 = vector.load %arg9[%c0_81, %c96_82] : memref<8x288xbf16, #tpu.memory_space<vmem>>, vector<8x128xbf16>
    %cst_83 = arith.constant dense<0.000000e+00> : vector<8x128xf32>
    %79 = tpu.matmul %77, %78, %cst_83 {dimension_numbers = #tpu.dot_dimension_numbers<[1], [0], [0], [1], [0, 0, 1, 1], [], []>} : vector<8x8xbf16>, vector<8x128xbf16>, vector<8x128xf32> -> vector<8x128xf32>
    %c1_84 = arith.constant 1 : index
    %c1_85 = arith.constant 1 : index
    %c0_86 = arith.constant 0 : index
    %c0_87 = arith.constant 0 : index
    %80 = vector.load %arg4[%c1_84, %c1_85, %c0_86, %c0_87] : memref<2x9x8x8xbf16, #tpu.memory_space<vmem>>, vector<1x1x8x8xbf16>
    %81 = vector.shape_cast %80 : vector<1x1x8x8xbf16> to vector<8x8xbf16>
    %c0_88 = arith.constant 0 : index
    %c104_89 = arith.constant 104 : index
    %82 = vector.load %arg9[%c0_88, %c104_89] : memref<8x288xbf16, #tpu.memory_space<vmem>>, vector<8x128xbf16>
    %cst_90 = arith.constant dense<0.000000e+00> : vector<8x128xf32>
    %83 = tpu.matmul %81, %82, %cst_90 {dimension_numbers = #tpu.dot_dimension_numbers<[1], [0], [0], [1], [0, 0, 1, 1], [], []>} : vector<8x8xbf16>, vector<8x128xbf16>, vector<8x128xf32> -> vector<8x128xf32>
    %84 = arith.addf %79, %83 : vector<8x128xf32>
    %c1_91 = arith.constant 1 : index
    %c2_92 = arith.constant 2 : index
    %c0_93 = arith.constant 0 : index
    %c0_94 = arith.constant 0 : index
    %85 = vector.load %arg4[%c1_91, %c2_92, %c0_93, %c0_94] : memref<2x9x8x8xbf16, #tpu.memory_space<vmem>>, vector<1x1x8x8xbf16>
    %86 = vector.shape_cast %85 : vector<1x1x8x8xbf16> to vector<8x8xbf16>
    %c0_95 = arith.constant 0 : index
    %c112_96 = arith.constant 112 : index
    %87 = vector.load %arg9[%c0_95, %c112_96] : memref<8x288xbf16, #tpu.memory_space<vmem>>, vector<8x128xbf16>
    %cst_97 = arith.constant dense<0.000000e+00> : vector<8x128xf32>
    %88 = tpu.matmul %86, %87, %cst_97 {dimension_numbers = #tpu.dot_dimension_numbers<[1], [0], [0], [1], [0, 0, 1, 1], [], []>} : vector<8x8xbf16>, vector<8x128xbf16>, vector<8x128xf32> -> vector<8x128xf32>
    %89 = arith.addf %84, %88 : vector<8x128xf32>
    %c1_98 = arith.constant 1 : index
    %c3_99 = arith.constant 3 : index
    %c0_100 = arith.constant 0 : index
    %c0_101 = arith.constant 0 : index
    %90 = vector.load %arg4[%c1_98, %c3_99, %c0_100, %c0_101] : memref<2x9x8x8xbf16, #tpu.memory_space<vmem>>, vector<1x1x8x8xbf16>
    %91 = vector.shape_cast %90 : vector<1x1x8x8xbf16> to vector<8x8xbf16>
    %c0_102 = arith.constant 0 : index
    %c120_103 = arith.constant 120 : index
    %92 = vector.load %arg9[%c0_102, %c120_103] : memref<8x288xbf16, #tpu.memory_space<vmem>>, vector<8x128xbf16>
    %cst_104 = arith.constant dense<0.000000e+00> : vector<8x128xf32>
    %93 = tpu.matmul %91, %92, %cst_104 {dimension_numbers = #tpu.dot_dimension_numbers<[1], [0], [0], [1], [0, 0, 1, 1], [], []>} : vector<8x8xbf16>, vector<8x128xbf16>, vector<8x128xf32> -> vector<8x128xf32>
    %94 = arith.addf %89, %93 : vector<8x128xf32>
    %c1_105 = arith.constant 1 : index
    %c4_106 = arith.constant 4 : index
    %c0_107 = arith.constant 0 : index
    %c0_108 = arith.constant 0 : index
    %95 = vector.load %arg4[%c1_105, %c4_106, %c0_107, %c0_108] : memref<2x9x8x8xbf16, #tpu.memory_space<vmem>>, vector<1x1x8x8xbf16>
    %96 = vector.shape_cast %95 : vector<1x1x8x8xbf16> to vector<8x8xbf16>
    %c0_109 = arith.constant 0 : index
    %c128_110 = arith.constant 128 : index
    %97 = vector.load %arg9[%c0_109, %c128_110] : memref<8x288xbf16, #tpu.memory_space<vmem>>, vector<8x128xbf16>
    %cst_111 = arith.constant dense<0.000000e+00> : vector<8x128xf32>
    %98 = tpu.matmul %96, %97, %cst_111 {dimension_numbers = #tpu.dot_dimension_numbers<[1], [0], [0], [1], [0, 0, 1, 1], [], []>} : vector<8x8xbf16>, vector<8x128xbf16>, vector<8x128xf32> -> vector<8x128xf32>
    %99 = arith.addf %94, %98 : vector<8x128xf32>
    %c1_112 = arith.constant 1 : index
    %c5_113 = arith.constant 5 : index
    %c0_114 = arith.constant 0 : index
    %c0_115 = arith.constant 0 : index
    %100 = vector.load %arg4[%c1_112, %c5_113, %c0_114, %c0_115] : memref<2x9x8x8xbf16, #tpu.memory_space<vmem>>, vector<1x1x8x8xbf16>
    %101 = vector.shape_cast %100 : vector<1x1x8x8xbf16> to vector<8x8xbf16>
    %c0_116 = arith.constant 0 : index
    %c136_117 = arith.constant 136 : index
    %102 = vector.load %arg9[%c0_116, %c136_117] : memref<8x288xbf16, #tpu.memory_space<vmem>>, vector<8x128xbf16>
    %cst_118 = arith.constant dense<0.000000e+00> : vector<8x128xf32>
    %103 = tpu.matmul %101, %102, %cst_118 {dimension_numbers = #tpu.dot_dimension_numbers<[1], [0], [0], [1], [0, 0, 1, 1], [], []>} : vector<8x8xbf16>, vector<8x128xbf16>, vector<8x128xf32> -> vector<8x128xf32>
    %104 = arith.addf %99, %103 : vector<8x128xf32>
    %c1_119 = arith.constant 1 : index
    %c6_120 = arith.constant 6 : index
    %c0_121 = arith.constant 0 : index
    %c0_122 = arith.constant 0 : index
    %105 = vector.load %arg4[%c1_119, %c6_120, %c0_121, %c0_122] : memref<2x9x8x8xbf16, #tpu.memory_space<vmem>>, vector<1x1x8x8xbf16>
    %106 = vector.shape_cast %105 : vector<1x1x8x8xbf16> to vector<8x8xbf16>
    %c0_123 = arith.constant 0 : index
    %c144_124 = arith.constant 144 : index
    %107 = vector.load %arg9[%c0_123, %c144_124] : memref<8x288xbf16, #tpu.memory_space<vmem>>, vector<8x128xbf16>
    %cst_125 = arith.constant dense<0.000000e+00> : vector<8x128xf32>
    %108 = tpu.matmul %106, %107, %cst_125 {dimension_numbers = #tpu.dot_dimension_numbers<[1], [0], [0], [1], [0, 0, 1, 1], [], []>} : vector<8x8xbf16>, vector<8x128xbf16>, vector<8x128xf32> -> vector<8x128xf32>
    %109 = arith.addf %104, %108 : vector<8x128xf32>
    %c1_126 = arith.constant 1 : index
    %c7_127 = arith.constant 7 : index
    %c0_128 = arith.constant 0 : index
    %c0_129 = arith.constant 0 : index
    %110 = vector.load %arg4[%c1_126, %c7_127, %c0_128, %c0_129] : memref<2x9x8x8xbf16, #tpu.memory_space<vmem>>, vector<1x1x8x8xbf16>
    %111 = vector.shape_cast %110 : vector<1x1x8x8xbf16> to vector<8x8xbf16>
    %c0_130 = arith.constant 0 : index
    %c152_131 = arith.constant 152 : index
    %112 = vector.load %arg9[%c0_130, %c152_131] : memref<8x288xbf16, #tpu.memory_space<vmem>>, vector<8x128xbf16>
    %cst_132 = arith.constant dense<0.000000e+00> : vector<8x128xf32>
    %113 = tpu.matmul %111, %112, %cst_132 {dimension_numbers = #tpu.dot_dimension_numbers<[1], [0], [0], [1], [0, 0, 1, 1], [], []>} : vector<8x8xbf16>, vector<8x128xbf16>, vector<8x128xf32> -> vector<8x128xf32>
    %114 = arith.addf %109, %113 : vector<8x128xf32>
    %c1_133 = arith.constant 1 : index
    %c8_134 = arith.constant 8 : index
    %c0_135 = arith.constant 0 : index
    %c0_136 = arith.constant 0 : index
    %115 = vector.load %arg4[%c1_133, %c8_134, %c0_135, %c0_136] : memref<2x9x8x8xbf16, #tpu.memory_space<vmem>>, vector<1x1x8x8xbf16>
    %116 = vector.shape_cast %115 : vector<1x1x8x8xbf16> to vector<8x8xbf16>
    %c0_137 = arith.constant 0 : index
    %c160_138 = arith.constant 160 : index
    %117 = vector.load %arg9[%c0_137, %c160_138] : memref<8x288xbf16, #tpu.memory_space<vmem>>, vector<8x128xbf16>
    %cst_139 = arith.constant dense<0.000000e+00> : vector<8x128xf32>
    %118 = tpu.matmul %116, %117, %cst_139 {dimension_numbers = #tpu.dot_dimension_numbers<[1], [0], [0], [1], [0, 0, 1, 1], [], []>} : vector<8x8xbf16>, vector<8x128xbf16>, vector<8x128xf32> -> vector<8x128xf32>
    %119 = arith.addf %114, %118 : vector<8x128xf32>
    %c1_140 = arith.constant 1 : index
    %c0_141 = arith.constant 0 : index
    %c0_142 = arith.constant 0 : index
    %120 = vector.load %arg5[%c1_140, %c0_141, %c0_142] : memref<2x8x1xf32, #tpu.memory_space<vmem>>, vector<1x8x1xf32>
    %121 = vector.shape_cast %120 : vector<1x8x1xf32> to vector<8x1xf32>
    %122 = vector.broadcast %121 : vector<8x1xf32> to vector<8x128xf32>
    %123 = arith.addf %119, %122 : vector<8x128xf32>
    %cst_143 = arith.constant 0.000000e+00 : f32
    %124 = vector.broadcast %cst_143 : f32 to vector<8x128xf32>
    %125 = arith.maximumf %123, %124 : vector<8x128xf32>
    %c0_144 = arith.constant 0 : index
    %c8_145 = arith.constant 8 : index
    %126 = vector.load %arg6[%c0_144, %c8_145] : memref<32x16xbf16, #tpu.memory_space<vmem>>, vector<32x8xbf16>
    %127 = arith.truncf %125 : vector<8x128xf32> to vector<8x128xbf16>
    %cst_146 = arith.constant dense<0.000000e+00> : vector<32x128xf32>
    %128 = tpu.matmul %126, %127, %cst_146 {dimension_numbers = #tpu.dot_dimension_numbers<[1], [0], [0], [1], [0, 0, 1, 1], [], []>} : vector<32x8xbf16>, vector<8x128xbf16>, vector<32x128xf32> -> vector<32x128xf32>
    %c0_147 = arith.constant 0 : index
    %c0_148 = arith.constant 0 : index
    %129 = vector.load %arg11[%c0_147, %c0_148] : memref<32x128xf32, #tpu.memory_space<vmem>>, vector<32x128xf32>
    %130 = arith.addf %129, %128 : vector<32x128xf32>
    %c0_149 = arith.constant 0 : index
    %c0_150 = arith.constant 0 : index
    %131 = vector.load %arg11[%c0_149, %c0_150] : memref<32x128xf32, #tpu.memory_space<vmem>>, vector<32x128xf32>
    tpu.vector_store %arg11[%c0_149, %c0_150], %130 {strides = array<i32>} : memref<32x128xf32, #tpu.memory_space<vmem>>, vector<32x128xf32>,
    %c0_151 = arith.constant 0 : index
    %c0_152 = arith.constant 0 : index
    %132 = vector.load %arg11[%c0_151, %c0_152] : memref<32x128xf32, #tpu.memory_space<vmem>>, vector<32x128xf32>
    %c0_153 = arith.constant 0 : index
    %c0_154 = arith.constant 0 : index
    %133 = vector.load %arg7[%c0_153, %c0_154] : memref<32x1xf32, #tpu.memory_space<vmem>>, vector<32x1xf32>
    %134 = vector.broadcast %133 : vector<32x1xf32> to vector<32x128xf32>
    %135 = arith.addf %132, %134 : vector<32x128xf32>
    %c0_155 = arith.constant 0 : index
    %c0_156 = arith.constant 0 : index
    %c0_157 = arith.constant 0 : index
    %136 = vector.load %arg1[%c0_155, %c0_156, %c0_157] : memref<1x32x128xbf16, #tpu.memory_space<vmem>>, vector<1x32x128xbf16>
    %137 = vector.shape_cast %136 : vector<1x32x128xbf16> to vector<32x128xbf16>
    %138 = arith.extf %137 : vector<32x128xbf16> to vector<32x128xf32>
    %139 = arith.addf %135, %138 : vector<32x128xf32>
    %cst_158 = arith.constant 0.000000e+00 : f32
    %140 = vector.broadcast %cst_158 : f32 to vector<32x128xf32>
    %141 = arith.maximumf %139, %140 : vector<32x128xf32>
    %c0_159 = arith.constant 0 : index
    %c0_160 = arith.constant 0 : index
    %c0_161 = arith.constant 0 : index
    %142 = vector.load %arg8[%c0_159, %c0_160, %c0_161] : memref<1x32x128xf32, #tpu.memory_space<vmem>>, vector<1x32x128xf32>
    %143 = vector.shape_cast %142 : vector<1x32x128xf32> to vector<32x128xf32>
    %144 = vector.shape_cast %141 : vector<32x128xf32> to vector<1x32x128xf32>
    tpu.vector_store %arg8[%c0_159, %c0_160, %c0_161], %144 {strides = array<i32>} : memref<1x32x128xf32, #tpu.memory_space<vmem>>, vector<1x32x128xf32>,
    return
  }
  func.func @transform_0(%arg0: i32) -> (i32, i32, i32) {
    %c0_i32 = arith.constant 0 : i32
    %c0_i32_0 = arith.constant 0 : i32
    %c0_i32_1 = arith.constant 0 : i32
    return %arg0, %c0_i32, %c0_i32_0 : i32, i32, i32
  }
  func.func @transform_1(%arg0: i32) -> (i32, i32) {
    %c0_i32 = arith.constant 0 : i32
    %c0_i32_0 = arith.constant 0 : i32
    %c0_i32_1 = arith.constant 0 : i32
    return %c0_i32, %c0_i32_0 : i32, i32
  }
  func.func @transform_2(%arg0: i32) -> (i32, i32) {
    %c0_i32 = arith.constant 0 : i32
    %c0_i32_0 = arith.constant 0 : i32
    %c0_i32_1 = arith.constant 0 : i32
    return %c0_i32, %c0_i32_0 : i32, i32
  }
  func.func @transform_3(%arg0: i32) -> (i32, i32, i32, i32) {
    %c0_i32 = arith.constant 0 : i32
    %c0_i32_0 = arith.constant 0 : i32
    %c0_i32_1 = arith.constant 0 : i32
    %c0_i32_2 = arith.constant 0 : i32
    %c0_i32_3 = arith.constant 0 : i32
    return %c0_i32, %c0_i32_0, %c0_i32_1, %c0_i32_2 : i32, i32, i32, i32
  }
  func.func @transform_4(%arg0: i32) -> (i32, i32, i32) {
    %c0_i32 = arith.constant 0 : i32
    %c0_i32_0 = arith.constant 0 : i32
    %c0_i32_1 = arith.constant 0 : i32
    %c0_i32_2 = arith.constant 0 : i32
    return %c0_i32, %c0_i32_0, %c0_i32_1 : i32, i32, i32
  }
  func.func @transform_5(%arg0: i32) -> (i32, i32) {
    %c0_i32 = arith.constant 0 : i32
    %c0_i32_0 = arith.constant 0 : i32
    %c0_i32_1 = arith.constant 0 : i32
    return %c0_i32, %c0_i32_0 : i32, i32
  }
  func.func @transform_6(%arg0: i32) -> (i32, i32) {
    %c0_i32 = arith.constant 0 : i32
    %c0_i32_0 = arith.constant 0 : i32
    %c0_i32_1 = arith.constant 0 : i32
    return %c0_i32, %c0_i32_0 : i32, i32
  }
  func.func @transform_7(%arg0: i32) -> (i32, i32, i32) {
    %c0_i32 = arith.constant 0 : i32
    %c0_i32_0 = arith.constant 0 : i32
    %c0_i32_1 = arith.constant 0 : i32
    return %arg0, %c0_i32, %c0_i32_0 : i32, i32, i32
  }
}

</mosaic_0001>

<bundles_post_ra>
// kernel: tpu_custom_call.1
= control target key start
LH: loop header
LB: loop body
LE: loop exit
PB: predicated region body
PF: predicated region fallthrough
CT: control target
= control target key end

     0   :  { %12 = vsyncpa [#allocation6], 0  ;;  %s3104_s0 = inlined_call_operand.hbm [shape: bf16[2,32,128], index: 0, kind: input, shape index: {}]   ;;  %s3105_s1 = inlined_call_operand.hbm [shape: bf16[16,32], index: 1, kind: input, shape index: {}]   ;;  %s3106_s2 = inlined_call_operand.hbm [shape: f32[16,1], index: 2, kind: input, shape index: {}]   ;;  %s3107_s3 = inlined_call_operand.hbm [shape: bf16[2,9,8,8], index: 3, kind: input, shape index: {}]   ;;  %s3108_s4 = inlined_call_operand.hbm [shape: f32[2,8,1], index: 4, kind: input, shape index: {}]   ;;  %s3109_s5 = inlined_call_operand.hbm [shape: bf16[32,16], index: 5, kind: input, shape index: {}]   ;;  %s3110_s6 = inlined_call_operand.hbm [shape: f32[32,1], index: 6, kind: input, shape index: {}]   ;;  %s3111_s7 = inlined_call_operand.hbm [shape: f32[2,32,128], index: 7, kind: output, shape index: {}]  }
   0x1   :  { %14 = vsyncpa [#allocation6 + $0x1], 0 }
   0x2   :  { %15 = vsyncpa [#allocation9], 0 }
   0x3   :  { %16 = vsyncpa [#allocation12], 0 }
   0x4   :  { %17 = vsyncpa [#allocation15], 0 }
   0x5   :  { %18 = vsyncpa [#allocation7], 0 }
   0x6   :  { %20 = vsyncpa [#allocation7 + $0x1], 0  ;;  %s2590_s24 = smov 0   ;;  %s2592_s25 = smov 0  }
   0x7   :  { %s2594_s26 = smov 0   ;;  %s2596_s27 = smov 0  }
   0x8 LB: > { %s2526_s28 = smov [#allocation8]   ;;  %s2611_s30 = sadd.s32 4294967295, %s2524_s27   ;;  %s2524_s27 = sphi %s2596_s27, %s3139_s27   ;;  %s2520_s26 = sphi %s2594_s26, %s3138_s26   ;;  %s2516_s25 = sphi %s2592_s25, %s3137_s25   ;;  %s2512_s24 = sphi %s2590_s24, %s3136_s24  }
   0x9   : > { %s221_s29 = sshll.u32 %s2526_s28, 4  ;;  %p1855_p0 = scmp.ge.s32.totalorder %s2524_s27, 1  ;;  %s2616_s29 = int_to_ptr.vmem [resolvable:$true] %s221_s29 }
   0xa   : > { %p3112_p1 = scmp.eq.s32.totalorder %s2611_s30, 0  ;;  %p209_p2 = scmp.lt.s32.totalorder %s2524_s27, 3 }
   0xb   : > { %s2527_s9 = smov [#allocation11]   ;;  %s2528_s12 = smov [#allocation14]  }
   0xc   : > { %p2618_p3 = pnand %p1855_p0, %p209_p2  ;;  %s247_s10 = sshll.u32 %s2527_s9, 4  ;;  %s2631_s10 = int_to_ptr.vmem [resolvable:$true] %s247_s10 }
   0xd   : > { %s273_s13 = sshll.u32 %s2528_s12, 4  ;;  %s2248_s16 = scalar_lea.hbm %s3105_s1, 128  ;;  %s2633_s13 = int_to_ptr.vmem [resolvable:$true] %s273_s13 }
   0xe   : > { %s3116_s8 = scalar_select %p2618_p3, 1, 0 }
   0xf   : > { %p2136_p5 = pneg %p2618_p3  ;;  %p2249_p7 = scmp.ne.s32.totalorder %s3105_s1, %s2248_s16 }
  0x10   : > { %p2255_p11 = scmp.lt.u32.totalorder %s2248_s16, %s3105_s1 }
  0x11   : > { %p2627_p6 = pnand %p2136_p5, %p3112_p1 }
  0x13   : > { %p2643_p8 = pneg %p2627_p6 }
  0x15   : > { %p2251_p9 = pnand %p2643_p8, %p2249_p7 }
  0x17   : > { %p2252_p10 = pneg %p2251_p9 }
  0x19   : > { %p2257_p12 = pnand %p2255_p11, %p2252_p10 }
  0x1b   : > { %2260 = shalt.err (!%p2257_p12)
}
  0x1c   : > { %s2261_s22 = scalar_lea.vmem %s2616_s29, 128  ;;  %p2269_p5 = scmp.lt.s32.totalorder %s2616_s29, %s2616_s29 }
  0x1d   : > { %p2262_p13 = scmp.ne.s32.totalorder %s2616_s29, %s2261_s22  ;;  %p2270_p4 = scmp.lt.s32.totalorder %s2261_s22, %s2261_s22 }
  0x1f   : > { %p2264_p0 = pnand %p2262_p13, %p2643_p8  ;;  %p2271_p7 = por %p2270_p4, %p2269_p5 }
  0x21   : > { %p2265_p2 = pneg %p2264_p0 }
  0x23   : > { %p2272_p9 = pnand %p2271_p7, %p2265_p2 }
  0x25   : > { %2275 = shalt.err (!%p2272_p9)
}
  0x26   : > { %s3114_s23 = smov 64   ;;  %s2530_s28 = smov 4  }
  0x27   : > { %2139 = dma.hbm_to_vmem [thread:$0]  (!%p2627_p6), %s3105_s1, 128, %s2616_s29, [#allocation9], %s3114_s23, %s3114_s23, %s2530_s28  }
  0x28   : > { %s2276_s16 = scalar_lea.hbm %s3107_s3, 1152 }
  0x29   : > { %p2277_p4 = scmp.ne.s32.totalorder %s3107_s3, %s2276_s16  ;;  %p2283_p12 = scmp.lt.u32.totalorder %s2276_s16, %s3107_s3 }
  0x2b   : > { %p2279_p10 = pnand %p2277_p4, %p2643_p8 }
  0x2d   : > { %p2280_p11 = pneg %p2279_p10 }
  0x2f   : > { %p2285_p13 = pnand %p2283_p12, %p2280_p11 }
  0x31   : > { %2288 = shalt.err (!%p2285_p13)
}
  0x32   : > { %s2289_s29 = scalar_lea.vmem %s2631_s10, 1152  ;;  %p2297_p7 = scmp.lt.s32.totalorder %s2631_s10, %s2631_s10 }
  0x33   : > { %p2290_p0 = scmp.ne.s32.totalorder %s2631_s10, %s2289_s29  ;;  %p2298_p9 = scmp.lt.s32.totalorder %s2289_s29, %s2289_s29 }
  0x35   : > { %p2292_p2 = pnand %p2290_p0, %p2643_p8  ;;  %p2299_p4 = por %p2298_p9, %p2297_p7 }
  0x37   : > { %p2293_p5 = pneg %p2292_p2 }
  0x39   : > { %p2300_p10 = pnand %p2299_p4, %p2293_p5 }
  0x3b   : > { %2303 = shalt.err (!%p2300_p10)
}
  0x3c   : > { %2145 = dma.hbm_to_vmem [thread:$0]  (!%p2627_p6), %s3107_s3, 1152, %s2631_s10, [#allocation12], %s3114_s23, %s3114_s23, %s2530_s28  }
  0x3d   : > { %s2304_s15 = scalar_lea.hbm %s3109_s5, 256 }
  0x3e   : > { %p2305_p11 = scmp.ne.s32.totalorder %s3109_s5, %s2304_s15  ;;  %p2311_p0 = scmp.lt.u32.totalorder %s2304_s15, %s3109_s5 }
  0x40   : > { %p2307_p12 = pnand %p2305_p11, %p2643_p8 }
  0x42   : > { %p2308_p13 = pneg %p2307_p12 }
  0x44   : > { %p2313_p2 = pnand %p2311_p0, %p2308_p13 }
  0x46   : > { %2316 = shalt.err (!%p2313_p2)
}
  0x47   : > { %s2317_s10 = scalar_lea.vmem %s2633_s13, 256  ;;  %p2325_p4 = scmp.lt.s32.totalorder %s2633_s13, %s2633_s13 }
  0x48   : > { %p2318_p5 = scmp.ne.s32.totalorder %s2633_s13, %s2317_s10  ;;  %p2326_p10 = scmp.lt.s32.totalorder %s2317_s10, %s2317_s10 }
  0x4a   : > { %p2320_p7 = pnand %p2318_p5, %p2643_p8  ;;  %p2327_p11 = por %p2326_p10, %p2325_p4 }
  0x4c   : > { %p2321_p9 = pneg %p2320_p7 }
  0x4e   : > { %p2328_p12 = pnand %p2327_p11, %p2321_p9 }
  0x50   : > { %2331 = shalt.err (!%p2328_p12)
}
  0x51   : > { %2151 = dma.hbm_to_vmem [thread:$0]  (!%p2627_p6), %s3109_s5, 256, %s2633_s13, [#allocation15], %s3114_s23, %s3114_s23, %s2530_s28  }
  0x52   : > { %s2531_s22 = smov [#allocation10]   ;;  %s2332_s15 = scalar_lea.hbm %s3106_s2, 256 }
  0x53   : > { %s234_s9 = sshll.u32 %s2531_s22, 4  ;;  %p2333_p13 = scmp.ne.s32.totalorder %s3106_s2, %s2332_s15  ;;  %s235_s9 = int_to_ptr.vmem [resolvable:$true] %s234_s9 }
  0x54   : > { %p2339_p5 = scmp.lt.u32.totalorder %s2332_s15, %s3106_s2 }
  0x55   : > { %p2335_p0 = pnand %p2333_p13, %p2643_p8 }
  0x57   : > { %p2336_p2 = pneg %p2335_p0 }
  0x59   : > { %p2341_p7 = pnand %p2339_p5, %p2336_p2 }
  0x5b   : > { %2344 = shalt.err (!%p2341_p7)
}
  0x5c   : > { %s2345_s13 = scalar_lea.vmem %s235_s9, 256  ;;  %p2353_p11 = scmp.lt.s32.totalorder %s235_s9, %s235_s9 }
  0x5d   : > { %p2346_p9 = scmp.ne.s32.totalorder %s235_s9, %s2345_s13  ;;  %p2354_p12 = scmp.lt.s32.totalorder %s2345_s13, %s2345_s13 }
  0x5f   : > { %p2348_p4 = pnand %p2346_p9, %p2643_p8  ;;  %p2355_p1 = por %p2354_p12, %p2353_p11 }
  0x61   : > { %p2349_p10 = pneg %p2348_p4 }
  0x63   : > { %p2356_p3 = pnand %p2355_p1, %p2349_p10 }
  0x65   : > { %2359 = shalt.err (!%p2356_p3)
}
  0x66   : > { %s2532_s10 = smov 128   ;;  %s2533_s21 = smov 8  }
  0x67   : > { %2142 = dma.hbm_to_vmem [thread:$0]  (!%p2627_p6), %s3106_s2, 256, %s235_s9, [#allocation9], %s2532_s10, %s2532_s10, %s2533_s21  }
  0x68   : > { %s2534_s12 = smov [#allocation13]   ;;  %s2535_s15 = smov [#allocation16]  }
  0x69   : > { %s260_s14 = sshll.u32 %s2534_s12, 4  ;;  %s286_s16 = sshll.u32 %s2535_s15, 4  ;;  %s261_s14 = int_to_ptr.vmem [resolvable:$true] %s260_s14  ;;  %s2740_s16 = int_to_ptr.vmem [resolvable:$true] %s286_s16 }
  0x6a   : > { %s2360_s20 = scalar_lea.hbm %s3108_s4, 256 }
  0x6b   : > { %p2361_p1 = scmp.ne.s32.totalorder %s3108_s4, %s2360_s20  ;;  %p2367_p0 = scmp.lt.u32.totalorder %s2360_s20, %s3108_s4 }
  0x6d   : > { %p2363_p3 = pnand %p2361_p1, %p2643_p8 }
  0x6f   : > { %p2364_p13 = pneg %p2363_p3 }
  0x71   : > { %p2369_p2 = pnand %p2367_p0, %p2364_p13 }
  0x73   : > { %2372 = shalt.err (!%p2369_p2)
}
  0x74   : > { %s2373_s22 = scalar_lea.vmem %s261_s14, 256  ;;  %p2381_p4 = scmp.lt.s32.totalorder %s261_s14, %s261_s14 }
  0x75   : > { %p2374_p5 = scmp.ne.s32.totalorder %s261_s14, %s2373_s22  ;;  %p2382_p10 = scmp.lt.s32.totalorder %s2373_s22, %s2373_s22 }
  0x77   : > { %p2376_p7 = pnand %p2374_p5, %p2643_p8  ;;  %p2383_p11 = por %p2382_p10, %p2381_p4 }
  0x79   : > { %p2377_p9 = pneg %p2376_p7 }
  0x7b   : > { %p2384_p12 = pnand %p2383_p11, %p2377_p9 }
  0x7d   : > { %2387 = shalt.err (!%p2384_p12)
}
  0x7e   : > { %2148 = dma.hbm_to_vmem [thread:$0]  (!%p2627_p6), %s3108_s4, 256, %s261_s14, [#allocation12], %s2532_s10, %s2532_s10, %s2533_s21  }
  0x7f   : > { %s2388_s18 = scalar_lea.hbm %s3110_s6, 512 }
  0x80   : > { %p2389_p1 = scmp.ne.s32.totalorder %s3110_s6, %s2388_s18  ;;  %p2395_p0 = scmp.lt.u32.totalorder %s2388_s18, %s3110_s6 }
  0x82   : > { %p2391_p3 = pnand %p2389_p1, %p2643_p8 }
  0x84   : > { %p2392_p13 = pneg %p2391_p3 }
  0x86   : > { %p2397_p2 = pnand %p2395_p0, %p2392_p13 }
  0x88   : > { %2400 = shalt.err (!%p2397_p2)
}
  0x89   : > { %s2401_s14 = scalar_lea.vmem %s2740_s16, 512  ;;  %p2409_p4 = scmp.lt.s32.totalorder %s2740_s16, %s2740_s16 }
  0x8a   : > { %p2402_p5 = scmp.ne.s32.totalorder %s2740_s16, %s2401_s14  ;;  %p2410_p10 = scmp.lt.s32.totalorder %s2401_s14, %s2401_s14 }
  0x8c   : > { %p2404_p7 = pnand %p2402_p5, %p2643_p8  ;;  %p2411_p11 = por %p2410_p10, %p2409_p4 }
  0x8e   : > { %p2405_p9 = pneg %p2404_p7 }
  0x90   : > { %p2412_p12 = pnand %p2411_p11, %p2405_p9 }
  0x92   : > { %2415 = shalt.err (!%p2412_p12)
}
  0x93   : > { %2154 = dma.hbm_to_vmem [thread:$0]  (!%p2627_p6), %s3110_s6, 512, %s2740_s16, [#allocation15], %s2532_s10, %s2532_s10, %s2533_s21  }
  0x94   : > { %s1854_s11 = sadd.s32 4294967294, %s2524_s27   ;;  %s2791_s19 = sadd.s32 1, %s2524_s27  }
  0x95   : > { %s30_s12 = ssub.s32 %s2524_s27, %s2791_s19  ;;  %s33_s15 = sadd.s32 1, %s2520_s26 }
  0x96   : > { %p31_p8 = scmp.eq.s32.totalorder %s30_s12, 0  ;;  %p40_p1 = scmp.ne.s32.totalorder %s2520_s26, %s2516_s25 }
  0x97   : > { %p41_p3 = scmp.eq.s32.totalorder %s2524_s27, 0  ;;  %p46_p13 = scmp.ne.s32.totalorder %s2516_s25, %s2512_s24 }
  0x98   : > { %s2802_s17 = scalar_select %p31_p8, %s2520_s26, %s33_s15  }
  0x99   : > { %p2804_p0 = por %p41_p3, %p40_p1  ;;  %p3120_p2 = scmp.eq.s32.totalorder %s2611_s30, 0 }
  0x9a   : > { %p196_p5 = scmp.eq.s32.totalorder %s2611_s30, 1  ;;  %p202_p7 = scmp.eq.s32.totalorder %s1854_s11, 1 }
  0x9b   : > { %p2810_p6 = por %p3120_p2, %p46_p13  ;;  %p2169_p9 = scmp.lt.s32.totalorder %s2524_s27, 2 }
  0x9c   : > { %s300_s21 = sand.u32 1, %s2520_s26   ;;  %p2817_p4 = por %p196_p5, %p40_p1 }
  0x9d   : > { %p2821_p10 = por %p202_p7, %p46_p13  ;;  %s1863_s13 = sshll.u32 %s300_s21, 4 }
  0x9e   : > { %s3122_s16 = scalar_select %p2817_p4, 1, 0 }
  0x9f   : > { %s3123_s20 = scalar_select %p2821_p10, 1, 0 }
  0xa0   : > { %s1918_s29 = sshll.u32 %s2524_s27, 8  ;;  %s304_s23 = scalar_lea.vmem [#allocation5], %s1863_s13 }
  0xa1   : > { %s2829_s22 = scalar_lea.hbm %s3104_s0, %s1918_s29  ;;  %s311_s11 = sshll.u32 %s304_s23, 4  ;;  %s2831_s11 = int_to_ptr.vmem [resolvable:$true] %s311_s11 }
  0xa2   : > { %p2835_p11 = pnand %p2169_p9, %p2804_p0  ;;  %s2839_s15 = scalar_lea.sflag [#allocation6], %s300_s21 }
  0xa3   : > { %s2416_s9 = scalar_lea.hbm %s2829_s22, 256  ;;  %s2421_s18 = scalar_lea.hbm %s3104_s0, 512 }
  0xa4   : > { %p2417_p12 = scmp.ne.s32.totalorder %s2829_s22, %s2416_s9  ;;  %p2418_p8 = pneg %p2835_p11 }
  0xa5   : > { %p2422_p13 = scmp.lt.u32.totalorder %s2829_s22, %s3104_s0  ;;  %p2423_p0 = scmp.lt.u32.totalorder %s2421_s18, %s2416_s9 }
  0xa6   : > { %p2419_p1 = pnand %p2418_p8, %p2417_p12  ;;  %p2425_p5 = scmp.lt.u32.totalorder %s2416_s9, %s2829_s22 }
  0xa7   : > { %p2424_p2 = por %p2423_p0, %p2422_p13 }
  0xa8   : > { %p2420_p3 = pneg %p2419_p1 }
  0xa9   : > { %p2426_p7 = por %p2425_p5, %p2424_p2 }
  0xab   : > { %p2427_p9 = pnand %p2426_p7, %p2420_p3 }
  0xad   : > { %2430 = shalt.err (!%p2427_p9)
}
  0xae   : > { %s2431_s21 = scalar_lea.vmem %s2831_s11, 256  ;;  %s2536_s13 = smov [#allocation5]  }
  0xaf   : > { %p2432_p12 = scmp.ne.s32.totalorder %s2831_s11, %s2431_s21  ;;  %s2436_s29 = sshll.u32 %s2536_s13, 4  ;;  %s2437_s29 = int_to_ptr.vmem [resolvable:$false] %s2436_s29 }
  0xb0   : > { %s2438_s14 = scalar_lea.vmem %s2437_s29, 512  ;;  %p2439_p4 = scmp.lt.s32.totalorder %s2831_s11, %s2437_s29 }
  0xb1   : > { %p2434_p1 = pnand %p2432_p12, %p2418_p8  ;;  %p2440_p13 = scmp.lt.s32.totalorder %s2438_s14, %s2431_s21 }
  0xb3   : > { %p2435_p10 = pneg %p2434_p1  ;;  %p2441_p0 = por %p2440_p13, %p2439_p4 }
  0xb5   : > { %p2442_p2 = pnand %p2441_p0, %p2435_p10 }
  0xb7   : > { %2445 = shalt.err (!%p2442_p2)
}
  0xb8   : > { %s3125_s9 = smov 64   ;;  %p3126_p8 = scmp.ne.s32.totalorder %s3116_s8, 0 }
  0xb9   : > { %2158 = dma.hbm_to_vmem [thread:$0]  (!%p2835_p11), %s2829_s22, 256, %s2831_s11, %s2839_s15, %s3125_s9, %s3125_s9, %s2530_s28  }
  0xba   : > { %323 = sbr.rel (%p3126_p8) target bundleno = 1455 (0x5af), region = 48  ;;  %s2873_s18 = sand.u32 (!%p3126_p8), 1, %s2516_s25  }
  0xbb   : > { %s1867_s23 = sshll.u32 (!%p3126_p8), %s2873_s18, 4  ;;  %s326_s21 = scalar_lea.sflag (!%p3126_p8), [#allocation6], %s2873_s18 }
  0xbc   : > { %s2877_s13 = scalar_lea.vmem (!%p3126_p8), [#allocation5], %s1867_s23 }
  0xc1   : > { %2491 = dma.done.wait (%p2810_p6), %s326_s21, 256  }
  0xc2   : > { %2493 = vsyncadd (%p2810_p6), %s326_s21, 4294967040  ;;  %p3127_p4 = scmp.eq.s32.totalorder %s2611_s30, 0 }
  0xc4   : > { %2495 = dma.done.wait (%p3127_p4), [#allocation9], 384   ;;  %p3128_p10 = pmov %p3127_p4 }
  0xc5   : > { %p3129_p11 = pmov %p3127_p4 }
  0xc6   : > { %2497 = vsyncadd (%p3128_p10), [#allocation9], 4294966912 }
  0xc7   : > { %2499 = dma.done.wait (%p3129_p11), [#allocation12], 1408   ;;  %p3130_p3 = pmov %p3127_p4 }
  0xc9   : > { %2501 = vsyncadd (%p3130_p3), [#allocation12], 4294965888  ;;  %p3131_p5 = pmov %p3130_p3 }
  0xca   : > { %p3132_p7 = pmov %p3130_p3 }
  0xcb   : > { %2503 = dma.done.wait (%p3131_p5), [#allocation15], 768  }
  0xcc   : > { %2505 = vsyncadd (%p3132_p7), [#allocation15], 4294966528  ;;  %v2537_v0 = vmov 0.0   ;;  %vm2538_vm0 = vmmov 0   ;;  %vm470_vm1 = vcmask 257024   ;;  %v2539_v1 = vmov 0  }
  0xcd   : > { %1974 = vmatprep.subr.bf16.mxu0 %v2537_v0  ;;  %1978 = vmatprep.mubr.msk.bf16.mxu0 %vm2538_vm0, %v2537_v0  ;;  %469 = vst [vmem:[#allocation2] sm:$0xf] %v2539_v1  ;;  %471 = vst.msk [vmem:[#allocation2 + $0x8] sm:$0xf] %vm470_vm1, %v2539_v1  ;;  %v2233_v2 = vld [vmem:[%s2877_s13] sm:$0xff]   ;;  %v2234_v3 = vld [vmem:[%s2877_s13 + $0x8] sm:$0xff]  }
  0xce   : > { %2231 = vset.pattern.permute.xlu0 %v2539_v1  ;;  %1982 = vmatprep.subr.bf16.mxu1 %v2537_v0  ;;  %v2235_v4 = vld [vmem:[#allocation8] sm:$0xff]   ;;  %v391_v5 = vld [vmem:[#allocation10] sm:$0xff]  ;;  %v392_v6 = vld [vmem:[#allocation10 + $0x8] sm:$0xff]  ;;  %vm420_vm2 = vcmask 261120   ;;  %s2540_s8 = smov 32   ;;  %s2541_s28 = smov 24  }
  0xcf   : > { %1984 = vmatprep.mubr.msk.bf16.mxu1 %vm2538_vm0, %v2537_v0  ;;  %2232 = vset.pattern.permute.xlu1 %v2539_v1  ;;  %s2542_s10 = smov 16   ;;  %s2543_s22 = smov 8   ;;  %v975_v25 = vld [vmem:[#allocation13] sm:$0xff]  ;;  %vm487_vm3 = vcmask 195584   ;;  %vm493_vm4 = vcmask 1043456   ;;  %vm489_vm5 = vcmask 64512  }
  0xd0   : > { %1975 = vmatpush3.bf16.msra.mxu0 %v2233_v2  ;;  %395 = vperm.xlu0 %2231, %v391_v5   ;;  %s2544_s11 = smov 120   ;;  %s2545_s12 = smov 112   ;;  %v477_v32 = vld [vmem:[#allocation11 + $0x4] sm:$0xf]  ;;  %vm595_vm6 = vcmask 130048   ;;  %vm761_vm7 = vcmask 982016  }
  0xd1   : > { %1976 = vmatprep.subr.bf16.mxu0 %v2537_v0  ;;  %s2546_s15 = smov 104   ;;  %s2547_s29 = smov 96   ;;  %v474_v41 = vld [vmem:[#allocation11] sm:$0xf]  ;;  %v590_v42 = vld [vmem:[#allocation11 + $0x8] sm:$0xf] }
  0xd2   : > { %vm816_vm8 = vcmask 916480   ;;  %v645_v51 = vld [vmem:[#allocation11 + $0xc] sm:$0xf]  ;;  %v700_v52 = vld [vmem:[#allocation11 + $0x10] sm:$0xf]  ;;  %vm871_vm9 = vcmask 850944  }
  0xd3   : > { %vm926_vm10 = vcmask 785408   ;;  %v750_v60 = vld [vmem:[#allocation11 + $0x14] sm:$0xf]  ;;  %v811_v61 = vld [vmem:[#allocation11 + $0x18] sm:$0xf]  ;;  %s1874_s14 = sshll.u32 %s2873_s18, 5 }
  0xd4   : > { %1977 = vmatpush3.bf16.msra.mxu0 %v2234_v3  ;;  %400 = vperm.xlu0 %2231, %v392_v6   ;;  %v921_v5 = vld [vmem:[#allocation11 + $0x20] sm:$0xf]  ;;  %s383_s9 = scalar_lea.vmem [#allocation17], %s1874_s14  ;;  %s1919_s21 = sshll.u32 %s2611_s30, 9 }
  0xd5   : > { %1994 = vmatprep.subr.bf16.mxu0 %v2537_v0  ;;  %s1724_s23 = sshll.u32 %s383_s9, 4  ;;  %p3133_p9 = scmp.ne.s32.totalorder %s3122_s16, 0  ;;  %s3054_s23 = int_to_ptr.vmem [resolvable:$true] %s1724_s23 }
  0xd6   : > { %s2446_s30 = scalar_lea.vmem %s3054_s23, 512 }
  0xd7   : > { %1979 = vmatmul.mubr.msk.bf16.vlgmr.msra.gmra.mrb[0].mxu0 %vm420_vm2, %v2235_v4  ;;  %v866_v4 = vld [vmem:[#allocation11 + $0x1c] sm:$0xf]  ;;  %p2447_p6 = scmp.ne.s32.totalorder %s3054_s23, %s2446_s30 }
  0xd8   : > { %1996 = vmatprep.mubr.msk.bf16.mxu0 %vm2538_vm0, %v2537_v0 }
  0xd9   : > { %p2448_p12 = pnand %p2447_p6, %p3133_p9 }
  0xdb   : > { %p2449_p1 = pneg %p2448_p12 }
 0x14f   : > { %v396_v7 = vpop.permute.xlu0 %395 }
 0x153   : > { %v401_v11 = vpop.permute.xlu0 %400 }
 0x1aa   : > { %v458_v8 = vpop.f32.mrb[0].mxu0 }
 0x1ab   : > { %v459_v9 = vadd.f32 %v458_v8, %v396_v7  ;;  %v1980_v10 = vpop.f32.mrb[1].mxu0 }
 0x1ac   : > { %v461_v12 = vpop.f32.mrb[2].mxu0 }
 0x1ad   : > { %v462_v13 = vadd.f32 %v461_v12, %v401_v11  ;;  %v1981_v14 = vpop.f32.mrb[3].mxu0  ;;  %v465_v15 = vmax.f32 %v459_v9, 0.0 }
 0x1af   : > { %v466_v16 = vmax.f32 %v462_v13, 0.0 }
 0x1b1   : > { %v467_v17 = vpack.c.bf16 %v466_v16, %v465_v15 }
 0x1b3   : > { %468 = vst [vmem:[#allocation3] sm:$0xff] %v467_v17 }
 0x1ba   : > { %v472_v18 = vld [vmem:[#allocation3] sm:$0xf] }
 0x1bb   : > { %473 = vst [vmem:[#allocation2 + $0x4] sm:$0xf] %v472_v18 }
 0x1c2   : > { %v475_v19 = vld [vmem:[#allocation2] sm:$0xff] }
 0x1c3   : > { %v1879_v20 = vcombine.low %v475_v19, %v475_v19  ;;  %v1880_v21 = vcombine.high %v475_v19, %v475_v19  ;;  %v751_v22 = vld [vmem:[#allocation2 + $0x4] sm:$0xff] }
 0x1c4   : > { %v1886_v23 = vcombine.low %v751_v22, %v751_v22  ;;  %v1887_v24 = vcombine.high %v751_v22, %v751_v22  ;;  %v701_v43 = vld [vmem:[#allocation2 + $0x4] sm:$0xf] }
 0x1c5   : > { %537 = vrot.lane.b32.xlu0 %v1879_v20, %s2540_s8  ;;  %483 = vrot.lane.b32.xlu1 %v1879_v20, %s2541_s28  ;;  %v706_v47 = vsel %vm493_vm4, %v701_v43, 0 }
 0x1c9   : > { %591 = vrot.lane.b32.xlu0 %v1879_v20, %s2542_s10  ;;  %485 = vrot.lane.b32.xlu1 %v1880_v21, %s2541_s28 }
 0x1cd   : > { %646 = vrot.lane.b32.xlu0 %v1879_v20, %s2543_s22  ;;  %539 = vrot.lane.b32.xlu1 %v1880_v21, %s2540_s8 }
 0x1d1   : > { %757 = vrot.lane.b32.xlu0 %v1886_v23, %s2544_s11  ;;  %593 = vrot.lane.b32.xlu1 %v1880_v21, %s2542_s10 }
 0x1d5   : > { %812 = vrot.lane.b32.xlu0 %v1886_v23, %s2545_s12  ;;  %648 = vrot.lane.b32.xlu1 %v1880_v21, %s2543_s22 }
 0x1d9   : > { %867 = vrot.lane.b32.xlu0 %v1886_v23, %s2546_s15  ;;  %759 = vrot.lane.b32.xlu1 %v1887_v24, %s2544_s11 }
 0x1dd   : > { %922 = vrot.lane.b32.xlu0 %v1886_v23, %s2547_s29  ;;  %814 = vrot.lane.b32.xlu1 %v1887_v24, %s2545_s12 }
 0x1e1   : > { %978 = vperm.xlu0 %2231, %v975_v25   ;;  %869 = vrot.lane.b32.xlu1 %v1887_v24, %s2546_s15 }
 0x1e5   : > { %924 = vrot.lane.b32.xlu1 %v1887_v24, %s2547_s29 }
 0x237   : > { %v538_v26 = vpop.permute.xlu0 %537  ;;  %v484_v27 = vpop.permute.xlu1 %483 }
 0x23b   : > { %v592_v28 = vpop.permute.xlu0 %591  ;;  %v486_v29 = vpop.permute.xlu1 %485 }
 0x23c   : > { %v488_v30 = vsel %vm487_vm3, %v484_v27, %v486_v29 }
 0x23d   : > { %v495_v31 = vsel %vm493_vm4, %v488_v30, 0 }
 0x23e   : > { %1983 = vmatpush3.bf16.msra.mxu1 %v495_v31 }
 0x23f   : > { %v647_v33 = vpop.permute.xlu0 %646  ;;  %v540_v34 = vpop.permute.xlu1 %539  ;;  %1988 = vmatprep.subr.bf16.mxu1 %v2537_v0 }
 0x240   : > { %v542_v35 = vsel %vm420_vm2, %v538_v26, %v540_v34 }
 0x241   : > { %v547_v36 = vsel %vm493_vm4, %v542_v35, 0  ;;  %1985 = vmatmul.mubr.msk.bf16.vlgmr.msra.gmra.mrb[0].mxu1 %vm489_vm5, %v477_v32 }
 0x242   : > { %1989 = vmatpush3.bf16.msra.mxu1 %v547_v36  ;;  %1990 = vmatprep.mubr.msk.bf16.mxu1 %vm2538_vm0, %v2537_v0 }
 0x243   : > { %v594_v37 = vpop.permute.xlu1 %593  ;;  %2000 = vmatprep.subr.bf16.mxu1 %v2537_v0  ;;  %v758_v39 = vpop.permute.xlu0 %757 }
 0x244   : > { %v596_v38 = vsel %vm595_vm6, %v592_v28, %v594_v37 }
 0x245   : > { %v601_v40 = vsel %vm493_vm4, %v596_v38, 0 }
 0x246   : > { %1995 = vmatpush3.bf16.msra.mxu0 %v601_v40 }
 0x247   : > { %v649_v44 = vpop.permute.xlu1 %648  ;;  %2006 = vmatprep.subr.bf16.mxu0 %v2537_v0  ;;  %v813_v48 = vpop.permute.xlu0 %812 }
 0x248   : > { %v651_v45 = vsel %vm489_vm5, %v647_v33, %v649_v44 }
 0x249   : > { %v656_v46 = vsel %vm493_vm4, %v651_v45, 0  ;;  %1991 = vmatmul.mubr.msk.bf16.vlgmr.msra.gmra.mrb[4].mxu1 %vm489_vm5, %v474_v41  ;;  %1997 = vmatmul.mubr.msk.bf16.vlgmr.msra.gmra.mrb[4].mxu0 %vm489_vm5, %v590_v42  ;;  %v1060_v42 = vld [vmem:[#allocation3] sm:$0xf0] }
 0x24a   : > { %2001 = vmatpush3.bf16.msra.mxu1 %v656_v46  ;;  %2007 = vmatpush3.bf16.msra.mxu0 %v706_v47 }
 0x24b   : > { %v760_v49 = vpop.permute.xlu1 %759  ;;  %2002 = vmatprep.mubr.msk.bf16.mxu1 %vm2538_vm0, %v2537_v0  ;;  %2008 = vmatprep.mubr.msk.bf16.mxu0 %vm2538_vm0, %v2537_v0  ;;  %v868_v55 = vpop.permute.xlu0 %867 }
 0x24c   : > { %2012 = vmatprep.subr.bf16.mxu1 %v2537_v0  ;;  %2018 = vmatprep.subr.bf16.mxu0 %v2537_v0  ;;  %v762_v50 = vsel %vm761_vm7, %v758_v39, %v760_v49  ;;  %v1062_v49 = vrot.slane %v1060_v42, 4 }
 0x24d   : > { %v767_v56 = vsel %vm493_vm4, %v762_v50, 0 }
 0x24f   : > { %v815_v53 = vpop.permute.xlu1 %814  ;;  %v923_v62 = vpop.permute.xlu0 %922 }
 0x250   : > { %v817_v54 = vsel %vm816_vm8, %v813_v48, %v815_v53 }
 0x251   : > { %v822_v57 = vsel %vm493_vm4, %v817_v54, 0  ;;  %2003 = vmatmul.mubr.msk.bf16.vlgmr.msra.gmra.mrb[8].mxu1 %vm489_vm5, %v645_v51  ;;  %2009 = vmatmul.mubr.msk.bf16.vlgmr.msra.gmra.mrb[8].mxu0 %vm489_vm5, %v700_v52 }
 0x252   : > { %2013 = vmatpush3.bf16.msra.mxu1 %v767_v56  ;;  %2019 = vmatpush3.bf16.msra.mxu0 %v822_v57 }
 0x253   : > { %v870_v58 = vpop.permute.xlu1 %869  ;;  %2014 = vmatprep.mubr.msk.bf16.mxu1 %vm2538_vm0, %v2537_v0  ;;  %2020 = vmatprep.mubr.msk.bf16.mxu0 %vm2538_vm0, %v2537_v0 }
 0x254   : > { %2024 = vmatprep.subr.bf16.mxu1 %v2537_v0  ;;  %2030 = vmatprep.subr.bf16.mxu0 %v2537_v0  ;;  %v872_v59 = vsel %vm871_vm9, %v868_v55, %v870_v58  ;;  %v1064_v55 = vunpack.c.l.bf16 %v1062_v49  ;;  %v2245_v58 = vld [vmem:[#allocation14] sm:$0xff]  }
 0x255   : > { %v877_v2 = vsel %vm493_vm4, %v872_v59, 0 }
 0x257   : > { %v925_v63 = vpop.permute.xlu1 %924 }
 0x258   : > { %v927_v1 = vsel %vm926_vm10, %v923_v62, %v925_v63 }
 0x259   : > { %v932_v3 = vsel %vm493_vm4, %v927_v1, 0  ;;  %2015 = vmatmul.mubr.msk.bf16.vlgmr.msra.gmra.mrb[12].mxu1 %vm489_vm5, %v750_v60  ;;  %2021 = vmatmul.mubr.msk.bf16.vlgmr.msra.gmra.mrb[12].mxu0 %vm489_vm5, %v811_v61  ;;  %v2246_v61 = vld [vmem:[#allocation14 + $0x8] sm:$0xff]  }
 0x25a   : > { %2025 = vmatpush3.bf16.msra.mxu1 %v877_v2  ;;  %2031 = vmatpush3.bf16.msra.mxu0 %v932_v3 }
 0x25b   : > { %2026 = vmatprep.mubr.msk.bf16.mxu1 %vm2538_vm0, %v2537_v0  ;;  %2032 = vmatprep.mubr.msk.bf16.mxu0 %vm2538_vm0, %v2537_v0 }
 0x25c   : > { %2042 = vmatprep.subr.bf16.mxu0 %v2537_v0 }
 0x260   : > { %v979_v52 = vpop.permute.xlu0 %978 }
 0x261   : > { %2027 = vmatmul.mubr.msk.bf16.vlgmr.msra.gmra.mrb[16].mxu1 %vm489_vm5, %v866_v4  ;;  %2033 = vmatmul.mubr.msk.bf16.vlgmr.msra.gmra.mrb[16].mxu0 %vm489_vm5, %v921_v5  ;;  %v2244_v5 = vld [vmem:[#allocation14] sm:$0xff]  }
 0x262   : > { %2044 = vmatprep.mubr.msk.bf16.mxu0 %vm2538_vm0, %v2537_v0  ;;  %2038 = vmatprep.mubr.msk.bf16.mxu1 %vm489_vm5, %v2245_v58 }
 0x314   : > { %v531_v6 = vpop.f32.mrb[0].mxu1 }
 0x315   : > { %v1986_v7 = vpop.f32.mrb[1].mxu1 }
 0x316   : > { %v534_v8 = vpop.f32.mrb[2].mxu1  ;;  %v1664_v7 = vld [vmem:[#allocation16 + $0x10] sm:$0xff] }
 0x317   : > { %v1987_v9 = vpop.f32.mrb[3].mxu1  ;;  %v1561_v8 = vld [vmem:[#allocation13 + $0x8] sm:$0xff] }
 0x318   : > { %v2247_v9 = vld [vmem:[#allocation14 + $0x8] sm:$0xff]  }
 0x31c   : > { %v583_v10 = vpop.f32.mrb[4].mxu1  ;;  %v637_v11 = vpop.f32.mrb[4].mxu0 }
 0x31d   : > { %v584_v12 = vadd.f32 %v583_v10, %v531_v6  ;;  %v1992_v13 = vpop.f32.mrb[5].mxu1  ;;  %v1998_v14 = vpop.f32.mrb[5].mxu0  ;;  %v1662_v6 = vld [vmem:[#allocation16] sm:$0xff]  ;;  %v1663_v10 = vld [vmem:[#allocation16 + $0x8] sm:$0xff] }
 0x31e   : > { %v586_v15 = vpop.f32.mrb[6].mxu1  ;;  %v640_v16 = vpop.f32.mrb[6].mxu0 }
 0x31f   : > { %v643_v17 = vadd.f32 %v637_v11, %v584_v12  ;;  %v1993_v18 = vpop.f32.mrb[7].mxu1  ;;  %v1999_v19 = vpop.f32.mrb[7].mxu0  ;;  %v1665_v11 = vld [vmem:[#allocation16 + $0x18] sm:$0xff]  ;;  %v1072_v16 = vld [vmem:[#allocation11 + $0x28] sm:$0xf] }
 0x324   : > { %v692_v20 = vpop.f32.mrb[8].mxu1  ;;  %v742_v21 = vpop.f32.mrb[8].mxu0 }
 0x325   : > { %v698_v22 = vadd.f32 %v692_v20, %v643_v17  ;;  %v2004_v23 = vpop.f32.mrb[9].mxu1  ;;  %v2010_v24 = vpop.f32.mrb[9].mxu0 }
 0x326   : > { %v695_v25 = vpop.f32.mrb[10].mxu1  ;;  %v745_v26 = vpop.f32.mrb[10].mxu0 }
 0x327   : > { %v748_v27 = vadd.f32 %v742_v21, %v698_v22  ;;  %v2005_v28 = vpop.f32.mrb[11].mxu1  ;;  %v2011_v29 = vpop.f32.mrb[11].mxu0  ;;  %v1069_v21 = vld [vmem:[#allocation11 + $0x24] sm:$0xf]  ;;  %v1181_v26 = vld [vmem:[#allocation11 + $0x2c] sm:$0xf] }
 0x32c   : > { %v803_v30 = vpop.f32.mrb[12].mxu1  ;;  %v858_v31 = vpop.f32.mrb[12].mxu0 }
 0x32d   : > { %v809_v32 = vadd.f32 %v803_v30, %v748_v27  ;;  %v2016_v33 = vpop.f32.mrb[13].mxu1  ;;  %v2022_v34 = vpop.f32.mrb[13].mxu0 }
 0x32e   : > { %v806_v35 = vpop.f32.mrb[14].mxu1  ;;  %v861_v36 = vpop.f32.mrb[14].mxu0  ;;  %v1235_v33 = vld [vmem:[#allocation11 + $0x30] sm:$0xf] }
 0x32f   : > { %v864_v37 = vadd.f32 %v858_v31, %v809_v32  ;;  %v2017_v38 = vpop.f32.mrb[15].mxu1  ;;  %v2023_v39 = vpop.f32.mrb[15].mxu0 }
 0x330   : > { %v1289_v38 = vld [vmem:[#allocation11 + $0x34] sm:$0xf] }
 0x334   : > { %v913_v40 = vpop.f32.mrb[16].mxu1  ;;  %v968_v41 = vpop.f32.mrb[16].mxu0 }
 0x335   : > { %v919_v43 = vadd.f32 %v913_v40, %v864_v37  ;;  %v2028_v44 = vpop.f32.mrb[17].mxu1  ;;  %v2034_v45 = vpop.f32.mrb[17].mxu0 }
 0x336   : > { %v916_v46 = vpop.f32.mrb[18].mxu1  ;;  %v971_v47 = vpop.f32.mrb[18].mxu0 }
 0x337   : > { %v974_v48 = vadd.f32 %v968_v41, %v919_v43  ;;  %v2029_v50 = vpop.f32.mrb[19].mxu1  ;;  %v2035_v51 = vpop.f32.mrb[19].mxu0  ;;  %v1339_v43 = vld [vmem:[#allocation11 + $0x38] sm:$0xf] }
 0x339   : > { %v981_v53 = vadd.f32 %v979_v52, %v974_v48  ;;  %v1399_v48 = vld [vmem:[#allocation11 + $0x3c] sm:$0xf] }
 0x33b   : > { %v982_v54 = vmax.f32 %v981_v53, 0.0  ;;  %v1453_v53 = vld [vmem:[#allocation11 + $0x40] sm:$0xf] }
 0x33d   : > { %v987_v56 = vpack.c.bf16 %v982_v54, %v982_v54  ;;  %v1065_v57 = vadd.f32 %v1064_v55, %v982_v54  ;;  %v1507_v55 = vld [vmem:[#allocation11 + $0x44] sm:$0xf] }
 0x33f   : > { %v1066_v59 = vpack.c.bf16 %v1065_v57, %v1065_v57  ;;  %2106 = vmatprep.subr.msk.bf16.mxu1 %vm493_vm4, %v987_v56  ;;  %v1005_v60 = vsel %vm493_vm4, %v987_v56, 0 }
 0x340   : > { %2037 = vmatpush3.bf16.msra.mxu1 %v1005_v60 }
 0x341   : > { %1067 = vst [vmem:[#allocation2 + $0x4] sm:$0xf] %v1066_v59  ;;  %2048 = vmatprep.subr.bf16.mxu1 %v2537_v0 }
 0x343   : > { %2039 = vmatmul.mubr.msk.bf16.vlgmr.msra.gmra.mrb[20].mxu1 %vm489_vm5, %v2246_v61 }
 0x344   : > { %2050 = vmatprep.mubr.msk.bf16.mxu1 %vm2538_vm0, %v2537_v0 }
 0x348   : > { %v1070_v62 = vld [vmem:[#allocation2] sm:$0xff] }
 0x349   : > { %v1897_v63 = vcombine.high %v1070_v62, %v1070_v62  ;;  %v1896_v1 = vcombine.low %v1070_v62, %v1070_v62  ;;  %v1340_v2 = vld [vmem:[#allocation2 + $0x4] sm:$0xff] }
 0x34a   : > { %v1904_v3 = vcombine.high %v1340_v2, %v1340_v2  ;;  %v1903_v4 = vcombine.low %v1340_v2, %v1340_v2  ;;  %v1290_v27 = vld [vmem:[#allocation2 + $0x4] sm:$0xf] }
 0x34b   : > { %1080 = vrot.lane.b32.xlu0 %v1897_v63, %s2541_s28  ;;  %1078 = vrot.lane.b32.xlu1 %v1896_v1, %s2541_s28  ;;  %v1295_v32 = vsel %vm493_vm4, %v1290_v27, 0  ;;  %s3059_s28 = scalar_lea.hbm %s3111_s7, %s1919_s21 }
 0x34f   : > { %1131 = vrot.lane.b32.xlu0 %v1897_v63, %s2540_s8  ;;  %1129 = vrot.lane.b32.xlu1 %v1896_v1, %s2540_s8 }
 0x353   : > { %1184 = vrot.lane.b32.xlu0 %v1897_v63, %s2542_s10  ;;  %1182 = vrot.lane.b32.xlu1 %v1896_v1, %s2542_s10  ;;  %s1711_s10 = scalar_lea.sflag [#allocation7], %s2873_s18 }
 0x357   : > { %1238 = vrot.lane.b32.xlu0 %v1897_v63, %s2543_s22  ;;  %1236 = vrot.lane.b32.xlu1 %v1896_v1, %s2543_s22 }
 0x35b   : > { %1348 = vrot.lane.b32.xlu0 %v1904_v3, %s2544_s11  ;;  %1346 = vrot.lane.b32.xlu1 %v1903_v4, %s2544_s11 }
 0x35f   : > { %1402 = vrot.lane.b32.xlu0 %v1904_v3, %s2545_s12  ;;  %1400 = vrot.lane.b32.xlu1 %v1903_v4, %s2545_s12 }
 0x363   : > { %1456 = vrot.lane.b32.xlu0 %v1904_v3, %s2546_s15  ;;  %1454 = vrot.lane.b32.xlu1 %v1903_v4, %s2546_s15 }
 0x367   : > { %1510 = vrot.lane.b32.xlu0 %v1904_v3, %s2547_s29  ;;  %1508 = vrot.lane.b32.xlu1 %v1903_v4, %s2547_s29 }
 0x36b   : > { %1584 = vrot.lane.b32.xlu0 %v2244_v5, %s2544_s11  ;;  %1564 = vperm.xlu1 %2232, %v1561_v8  }
 0x36f   : > { %1668 = vperm.xlu0 %2231, %v1662_v6   ;;  %1586 = vrot.lane.b32.xlu1 %v2247_v9, %s2544_s11  ;;  %s2548_s11 = smov [#allocation17]  }
 0x370   : > { %s2450_s12 = sshll.u32 %s2548_s11, 4  ;;  %s2451_s12 = int_to_ptr.vmem [resolvable:$false] %s2450_s12 }
 0x371   : > { %s2452_s15 = scalar_lea.vmem %s2451_s12, 1024  ;;  %p2453_p13 = scmp.lt.s32.totalorder %s3054_s23, %s2451_s12 }
 0x372   : > { %p2454_p0 = scmp.lt.s32.totalorder %s2452_s15, %s2446_s30 }
 0x373   : > { %1678 = vperm.xlu0 %2231, %v1664_v7   ;;  %1673 = vperm.xlu1 %2232, %v1663_v10  }
 0x374   : > { %p2455_p2 = por %p2454_p0, %p2453_p13 }
 0x376   : > { %p2456_p8 = pnand %p2455_p2, %p2449_p1 }
 0x377   : > { %1683 = vperm.xlu1 %2232, %v1665_v11  }
 0x3bd   : > { %v1081_v12 = vpop.permute.xlu0 %1080  ;;  %v1079_v13 = vpop.permute.xlu1 %1078 }
 0x3be   : > { %v1082_v14 = vsel %vm487_vm3, %v1079_v13, %v1081_v12 }
 0x3bf   : > { %v1087_v15 = vsel %vm493_vm4, %v1082_v14, 0 }
 0x3c0   : > { %2043 = vmatpush3.bf16.msra.mxu0 %v1087_v15 }
 0x3c1   : > { %v1132_v17 = vpop.permute.xlu0 %1131  ;;  %v1130_v18 = vpop.permute.xlu1 %1129  ;;  %2054 = vmatprep.subr.bf16.mxu0 %v2537_v0 }
 0x3c2   : > { %v1133_v19 = vsel %vm420_vm2, %v1130_v18, %v1132_v17 }
 0x3c3   : > { %v1138_v20 = vsel %vm493_vm4, %v1133_v19, 0  ;;  %2045 = vmatmul.mubr.msk.bf16.vlgmr.msra.gmra.mrb[20].mxu0 %vm489_vm5, %v1072_v16 }
 0x3c4   : > { %2049 = vmatpush3.bf16.msra.mxu1 %v1138_v20  ;;  %2056 = vmatprep.mubr.msk.bf16.mxu0 %vm2538_vm0, %v2537_v0 }
 0x3c5   : > { %v1185_v22 = vpop.permute.xlu0 %1184  ;;  %v1183_v23 = vpop.permute.xlu1 %1182  ;;  %2060 = vmatprep.subr.bf16.mxu1 %v2537_v0 }
 0x3c6   : > { %v1186_v24 = vsel %vm595_vm6, %v1183_v23, %v1185_v22 }
 0x3c7   : > { %v1191_v25 = vsel %vm493_vm4, %v1186_v24, 0  ;;  %2051 = vmatmul.mubr.msk.bf16.vlgmr.msra.gmra.mrb[24].mxu1 %vm489_vm5, %v1069_v21 }
 0x3c8   : > { %2055 = vmatpush3.bf16.msra.mxu0 %v1191_v25  ;;  %2062 = vmatprep.mubr.msk.bf16.mxu1 %vm2538_vm0, %v2537_v0 }
 0x3c9   : > { %v1239_v28 = vpop.permute.xlu0 %1238  ;;  %v1237_v29 = vpop.permute.xlu1 %1236  ;;  %2066 = vmatprep.subr.bf16.mxu0 %v2537_v0 }
 0x3ca   : > { %v1240_v30 = vsel %vm489_vm5, %v1237_v29, %v1239_v28 }
 0x3cb   : > { %v1245_v31 = vsel %vm493_vm4, %v1240_v30, 0  ;;  %2057 = vmatmul.mubr.msk.bf16.vlgmr.msra.gmra.mrb[24].mxu0 %vm489_vm5, %v1181_v26 }
 0x3cc   : > { %2061 = vmatpush3.bf16.msra.mxu1 %v1245_v31  ;;  %2067 = vmatpush3.bf16.msra.mxu0 %v1295_v32 }
 0x3cd   : > { %v1349_v34 = vpop.permute.xlu0 %1348  ;;  %v1347_v35 = vpop.permute.xlu1 %1346  ;;  %2072 = vmatprep.subr.bf16.mxu1 %v2537_v0  ;;  %2068 = vmatprep.mubr.msk.bf16.mxu0 %vm2538_vm0, %v2537_v0 }
 0x3ce   : > { %v1350_v36 = vsel %vm761_vm7, %v1347_v35, %v1349_v34  ;;  %2078 = vmatprep.subr.bf16.mxu0 %v2537_v0 }
 0x3cf   : > { %v1355_v37 = vsel %vm493_vm4, %v1350_v36, 0  ;;  %2063 = vmatmul.mubr.msk.bf16.vlgmr.msra.gmra.mrb[28].mxu1 %vm489_vm5, %v1235_v33 }
 0x3d0   : > { %2073 = vmatpush3.bf16.msra.mxu1 %v1355_v37  ;;  %2074 = vmatprep.mubr.msk.bf16.mxu1 %vm2538_vm0, %v2537_v0 }
 0x3d1   : > { %v1403_v39 = vpop.permute.xlu0 %1402  ;;  %v1401_v40 = vpop.permute.xlu1 %1400  ;;  %2084 = vmatprep.subr.bf16.mxu1 %v2537_v0 }
 0x3d2   : > { %v1404_v41 = vsel %vm816_vm8, %v1401_v40, %v1403_v39 }
 0x3d3   : > { %v1409_v42 = vsel %vm493_vm4, %v1404_v41, 0  ;;  %2069 = vmatmul.mubr.msk.bf16.vlgmr.msra.gmra.mrb[28].mxu0 %vm489_vm5, %v1289_v38 }
 0x3d4   : > { %2079 = vmatpush3.bf16.msra.mxu0 %v1409_v42  ;;  %2080 = vmatprep.mubr.msk.bf16.mxu0 %vm2538_vm0, %v2537_v0 }
 0x3d5   : > { %v1457_v44 = vpop.permute.xlu0 %1456  ;;  %v1455_v45 = vpop.permute.xlu1 %1454  ;;  %2090 = vmatprep.subr.bf16.mxu0 %v2537_v0 }
 0x3d6   : > { %v1458_v46 = vsel %vm871_vm9, %v1455_v45, %v1457_v44  ;;  %v1928_v44 = vld [vmem:[%s2877_s13 + $0x8] sm:$0xff]   ;;  %v1921_v45 = vld [vmem:[%s2877_s13] sm:$0xff]  }
 0x3d7   : > { %v1463_v47 = vsel %vm493_vm4, %v1458_v46, 0  ;;  %2075 = vmatmul.mubr.msk.bf16.vlgmr.msra.gmra.mrb[32].mxu1 %vm489_vm5, %v1339_v43  ;;  %v1926_v46 = vunpack.c.l.bf16 %v1928_v44 }
 0x3d8   : > { %2085 = vmatpush3.bf16.msra.mxu1 %v1463_v47  ;;  %2086 = vmatprep.mubr.msk.bf16.mxu1 %vm2538_vm0, %v2537_v0 }
 0x3d9   : > { %v1511_v49 = vpop.permute.xlu0 %1510  ;;  %v1509_v50 = vpop.permute.xlu1 %1508 }
 0x3da   : > { %v1512_v51 = vsel %vm926_vm10, %v1509_v50, %v1511_v49  ;;  %v1922_v49 = vunpack.c.l.bf16 %v1921_v45 }
 0x3db   : > { %v1517_v52 = vsel %vm493_vm4, %v1512_v51, 0  ;;  %2081 = vmatmul.mubr.msk.bf16.vlgmr.msra.gmra.mrb[32].mxu0 %vm489_vm5, %v1399_v48 }
 0x3dc   : > { %2091 = vmatpush3.bf16.msra.mxu0 %v1517_v52  ;;  %2092 = vmatprep.mubr.msk.bf16.mxu0 %vm2538_vm0, %v2537_v0  ;;  %v1927_v52 = vunpack.c.h.bf16 %v1928_v44 }
 0x3dd   : > { %v1585_v54 = vpop.permute.xlu0 %1584 }
 0x3df   : > { %2087 = vmatmul.mubr.msk.bf16.vlgmr.msra.gmra.mrb[36].mxu1 %vm489_vm5, %v1453_v53 }
 0x3e0   : > { %2098 = vmatprep.mubr.msk.bf16.mxu1 %vm489_vm5, %v1585_v54 }
 0x3e3   : > { %2093 = vmatmul.mubr.msk.bf16.vlgmr.msra.gmra.mrb[36].mxu0 %vm489_vm5, %v1507_v55 }
 0x3ea   : > { %v1565_v34 = vpop.permute.xlu1 %1564 }
 0x3ee   : > { %v1587_v41 = vpop.permute.xlu1 %1586  ;;  %v1669_v42 = vpop.permute.xlu0 %1668 }
 0x3f2   : > { %v1674_v43 = vpop.permute.xlu1 %1673  ;;  %v1679_v47 = vpop.permute.xlu0 %1678 }
 0x3f6   : > { %v1684_v53 = vpop.permute.xlu1 %1683 }
 0x496   : > { %v1123_v56 = vpop.f32.mrb[20].mxu0 }
 0x497   : > { %v2046_v57 = vpop.f32.mrb[21].mxu0 }
 0x498   : > { %v1126_v58 = vpop.f32.mrb[22].mxu0 }
 0x499   : > { %v2047_v59 = vpop.f32.mrb[23].mxu0 }
 0x49a   : > { %v1174_v60 = vpop.f32.mrb[24].mxu1 }
 0x49b   : > { %v1175_v61 = vadd.f32 %v1174_v60, %v1123_v56  ;;  %v2052_v62 = vpop.f32.mrb[25].mxu1  ;;  %v1923_v56 = vunpack.c.h.bf16 %v1921_v45 }
 0x49c   : > { %v1177_v63 = vpop.f32.mrb[26].mxu1 }
 0x49d   : > { %v2053_v1 = vpop.f32.mrb[27].mxu1 }
 0x49e   : > { %v1227_v2 = vpop.f32.mrb[24].mxu0 }
 0x49f   : > { %v1233_v3 = vadd.f32 %v1227_v2, %v1175_v61  ;;  %v2058_v0 = vpop.f32.mrb[25].mxu0 }
 0x4a0   : > { %v1230_v4 = vpop.f32.mrb[26].mxu0 }
 0x4a1   : > { %v2059_v5 = vpop.f32.mrb[27].mxu0 }
 0x4a2   : > { %v1281_v6 = vpop.f32.mrb[28].mxu1 }
 0x4a3   : > { %v1287_v7 = vadd.f32 %v1281_v6, %v1233_v3  ;;  %v2064_v8 = vpop.f32.mrb[29].mxu1 }
 0x4a4   : > { %v1284_v9 = vpop.f32.mrb[30].mxu1 }
 0x4a5   : > { %v2065_v10 = vpop.f32.mrb[31].mxu1 }
 0x4a6   : > { %v1331_v11 = vpop.f32.mrb[28].mxu0 }
 0x4a7   : > { %v1337_v12 = vadd.f32 %v1331_v11, %v1287_v7  ;;  %v2070_v13 = vpop.f32.mrb[29].mxu0 }
 0x4a8   : > { %v1334_v14 = vpop.f32.mrb[30].mxu0 }
 0x4a9   : > { %v2071_v15 = vpop.f32.mrb[31].mxu0 }
 0x4aa   : > { %v1391_v16 = vpop.f32.mrb[32].mxu1 }
 0x4ab   : > { %v1397_v17 = vadd.f32 %v1391_v16, %v1337_v12  ;;  %v2076_v18 = vpop.f32.mrb[33].mxu1 }
 0x4ac   : > { %v1394_v19 = vpop.f32.mrb[34].mxu1 }
 0x4ad   : > { %v2077_v20 = vpop.f32.mrb[35].mxu1 }
 0x4ae   : > { %v1445_v21 = vpop.f32.mrb[32].mxu0 }
 0x4af   : > { %v1451_v22 = vadd.f32 %v1445_v21, %v1397_v17  ;;  %v2082_v23 = vpop.f32.mrb[33].mxu0 }
 0x4b0   : > { %v1448_v24 = vpop.f32.mrb[34].mxu0 }
 0x4b1   : > { %v2083_v25 = vpop.f32.mrb[35].mxu0 }
 0x4b2   : > { %v1499_v26 = vpop.f32.mrb[36].mxu1 }
 0x4b3   : > { %v1505_v27 = vadd.f32 %v1499_v26, %v1451_v22  ;;  %v2088_v28 = vpop.f32.mrb[37].mxu1 }
 0x4b4   : > { %v1502_v29 = vpop.f32.mrb[38].mxu1 }
 0x4b5   : > { %v2089_v30 = vpop.f32.mrb[39].mxu1 }
 0x4b6   : > { %v1553_v31 = vpop.f32.mrb[36].mxu0 }
 0x4b7   : > { %v1559_v32 = vadd.f32 %v1553_v31, %v1505_v27  ;;  %v2094_v33 = vpop.f32.mrb[37].mxu0 }
 0x4b8   : > { %v1556_v35 = vpop.f32.mrb[38].mxu0 }
 0x4b9   : > { %v1567_v36 = vadd.f32 %v1565_v34, %v1559_v32  ;;  %v2095_v37 = vpop.f32.mrb[39].mxu0 }
 0x4bb   : > { %v1568_v38 = vmax.f32 %v1567_v36, 0.0 }
 0x4bd   : > { %v1573_v39 = vpack.c.bf16 %v1568_v38, %v1568_v38 }
 0x4bf   : > { %2107 = vmatprep.subr.msk.bf16.mxu1 %vm493_vm4, %v1573_v39  ;;  %v1595_v40 = vsel %vm493_vm4, %v1573_v39, 0 }
 0x4c0   : > { %2097 = vmatpush3.bf16.msra.mxu1 %v1595_v40 }
 0x4c3   : > { %2099 = vmatmul.mubr.msk.bf16.vlgmr.msra.gmra.mrb[20].mxu1 %vm489_vm5, %v1587_v41 }
 0x596   : > { %v2100_v48 = vpop.f32.mrb[20].mxu1 }
 0x597   : > { %v1688_v50 = vadd.f32 %v2100_v48, %v1679_v47  ;;  %v1631_v51 = vpop.f32.mrb[21].mxu1 }
 0x598   : > { %v1686_v54 = vadd.f32 %v1669_v42, %v1631_v51  ;;  %v2101_v55 = vpop.f32.mrb[22].mxu1 }
 0x599   : > { %v1700_v57 = vadd.f32 %v1926_v46, %v1688_v50  ;;  %v1689_v58 = vadd.f32 %v2101_v55, %v1684_v53  ;;  %v1634_v59 = vpop.f32.mrb[23].mxu1 }
 0x59a   : > { %v1698_v60 = vadd.f32 %v1922_v49, %v1686_v54  ;;  %v1687_v61 = vadd.f32 %v1674_v43, %v1634_v59 }
 0x59b   : > { %v1704_v62 = vmax.f32 %v1700_v57, 0.0  ;;  %v1701_v63 = vadd.f32 %v1927_v52, %v1689_v58 }
 0x59c   : > { %v1702_v1 = vmax.f32 %v1698_v60, 0.0  ;;  %v1699_v2 = vadd.f32 %v1923_v56, %v1687_v61 }
 0x59d   : > { %1708 = vst [vmem:[%s383_s9 + $0x10] sm:$0xff] %v1704_v62  ;;  %v1705_v3 = vmax.f32 %v1701_v63, 0.0 }
 0x59e   : > { %1706 = vst [vmem:[%s383_s9] sm:$0xff] %v1702_v1  ;;  %v1703_v0 = vmax.f32 %v1699_v2, 0.0 }
 0x59f   : > { %1709 = vst [vmem:[%s383_s9 + $0x18] sm:$0xff] %v1705_v3 }
 0x5a0   : > { %1707 = vst [vmem:[%s383_s9 + $0x8] sm:$0xff] %v1703_v0 }
 0x5a1   : > { %2459 = shalt.err (!%p2456_p8)
}
 0x5a2   : > { %s2460_s29 = scalar_lea.hbm %s3059_s28, 512  ;;  %s2464_s21 = scalar_lea.hbm %s3111_s7, 1024 }
 0x5a3   : > { %p2461_p4 = scmp.ne.s32.totalorder %s3059_s28, %s2460_s29  ;;  %p2465_p3 = scmp.lt.u32.totalorder %s3059_s28, %s3111_s7 }
 0x5a4   : > { %p2466_p5 = scmp.lt.u32.totalorder %s2464_s21, %s2460_s29  ;;  %p2468_p6 = scmp.lt.u32.totalorder %s2460_s29, %s3059_s28 }
 0x5a5   : > { %p2462_p10 = pnand %p2461_p4, %p3133_p9 }
 0x5a6   : > { %p2467_p7 = por %p2466_p5, %p2465_p3 }
 0x5a7   : > { %p2463_p11 = pneg %p2462_p10 }
 0x5a8   : > { %p2469_p12 = por %p2468_p6, %p2467_p7 }
 0x5aa   : > { %p2470_p1 = pnand %p2469_p12, %p2463_p11 }
 0x5ac   : > { %2473 = shalt.err (!%p2470_p1)
}
 0x5ad   : > { %s2549_s30 = smov 128  }
 0x5ae   : > { %2134 = dma.vmem_to_hbm [thread:$0]  (%p3133_p9), %s3054_s23, 512, %s3059_s28, %s1711_s10, %s2549_s30, %s2549_s30, %s2543_s22  }
 0x5af PF: > { %s1739_s11 = sand.u32 1, %s2512_s24   ;;  %p3134_p13 = scmp.ne.s32.totalorder %s3123_s20, 0 }
 0x5b0   : > { %p3135_p0 = scmp.ge.s32.totalorder %s2524_s27, 2  ;;  %s1740_s12 = scalar_lea.sflag [#allocation7], %s1739_s11 }
 0x5b2   : > { %p2160_p2 = pnand %p3135_p0, %p3134_p13 }
 0x5b4   : > { %2507 = dma.done.wait (!%p2160_p2), %s1740_s12, 512  }
 0x5b5   : > { %2509 = vsyncadd (!%p2160_p2), %s1740_s12, 4294966784  ;;  %p23_p8 = scmp.ge.s32.totalorder %s2791_s19, 4   ;;  %s3136_s24 = smov %s2516_s25 }
 0x5b6   : > { %s3137_s25 = smov %s2520_s26  ;;  %s3138_s26 = smov %s2802_s17 }
 0x5b7   : > { %s3139_s27 = smov %s2791_s19  ;;  %25 = sbr.rel (!%p23_p8) target bundleno = 8 (0x8), region = 135 }
 0x5be   :  { %1745 = vsyncpa [#allocation6], 1 }
 0x5bf   :  { %1747 = vsyncpa [#allocation6 + $0x1], 1 }
 0x5c0   :  { %1748 = vsyncpa [#allocation9], 1 }
 0x5c1   :  { %1749 = vsyncpa [#allocation12], 1 }
 0x5c2   :  { %1750 = vsyncpa [#allocation15], 1 }
 0x5c3   :  { %1751 = vsyncpa [#allocation7], 1 }
 0x5c4   :  { %1753 = vsyncpa [#allocation7 + $0x1], 1 }

</bundles_post_ra>
